<compile_context>
chip_gen: v7x
topology: tpu7x:2x2x1
jax: 0.10.0
libtpu: 0.0.40
codegen_flags: <defaults>
</compile_context>

<pallas_src>
import jax
import jax.numpy as jnp
from jax.experimental import pallas as pl
from jax.experimental.pallas import tpu as pltpu


def _round_up(x, m):
    return (x + m - 1) // m * m


def _default_vmem_limit():
    """Per-generation VMEM cap with headroom below physical capacity."""
    try:
        cap = int(pltpu.get_tpu_info().vmem_capacity_bytes)
    except Exception:
        cap = 64 * 1024 * 1024  # conservative (v7x-sized) fallback
    # ~85% of physical: leaves room for Mosaic internal scratch.
    # v6e/v5e (128 MiB) -> ~109 MiB; v7x (64 MiB) -> ~54 MiB.
    return max(int(cap * 0.85), 32 * 1024 * 1024)


def select_llama_mlp_tiles(M, H, I, dtype, *, vmem_limit_bytes=None, ti=None):
    """Pick generation-aware (tm, ti) from the VMEM budget.

    If `ti` is given (weights already prepped at that granularity), only tm is
    chosen.
    """
    if vmem_limit_bytes is None:
        vmem_limit_bytes = _default_vmem_limit()
    budget = int(vmem_limit_bytes * 0.9)
    b = jnp.dtype(dtype).itemsize

    def fits(tm, ti_):
        # x & out tiles (double-buffered each) + f32 accumulator
        #   -> tm*H*(4*b + 4)
        # wgu (H, 2*ti) & wd (ti, H) weight tiles (double-buffered each)
        #   -> 6*ti*H*b
        return tm * H * (4 * b + 4) + 6 * ti_ * H * b <= budget

    M16 = _round_up(max(M, 1), 16)
    i_cap = max(_round_up(I, 128), 128)
    decode = M16 <= 64

    if decode:
        # Decode is weight-bandwidth bound: few, large, contiguous weight DMAs.
        tm = M16
        if ti is None:
            ti = 128
            for cand in (256, 512, 1024, 2048, 4096):
                if cand <= i_cap and fits(tm, cand):
                    ti = cand
        return tm, ti

    if ti is None:
        ti = 512 if (i_cap >= 512 and fits(512, 512)) else max(min(256, i_cap), 128)

    # Prefill: weights are re-streamed once per row tile -> biggest tm that fits.
    for tm in (1024, 768, 512, 384, 256, 128, 64, 32, 16):
        tm_eff = min(tm, M16)
        if fits(tm_eff, ti):
            return tm_eff, ti
    return min(128, M16), ti


def _llama_mlp_kernel(x_ref, wgu_ref, wd_ref, o_ref, acc_ref):
    # x_ref  : (tm, H)         token-row tile (same block across the I axis)
    # wgu_ref: (1, H, 2*ti)    tile-contiguous fused [gate_j | up_j] weights
    # wd_ref : (ti, H)         down_proj weight tile for I-block j
    # o_ref  : (tm, H)         output tile (same block for every j)
    # acc_ref: (tm, H) f32     down_proj accumulator (VMEM scratch)
    j = pl.program_id(1)
    ti = wd_ref.shape[0]

    @pl.when(j == 0)
    def _():
        acc_ref[...] = jnp.zeros_like(acc_ref)

    x = x_ref[...]
    # One MXU matmul produces both gate and up projections for this I-block.
    gu = jnp.dot(x, wgu_ref[0], preferred_element_type=jnp.float32)  # (tm, 2*ti)
    g = gu[:, :ti]
    u = gu[:, ti:]
    h = (g * jax.nn.sigmoid(g)) * u                      # SiLU(gate) * up, f32
    acc_ref[...] += jnp.dot(h.astype(wd_ref.dtype), wd_ref[...],
                            preferred_element_type=jnp.float32)

    @pl.when(j == pl.num_programs(1) - 1)
    def _():
        o_ref[...] = acc_ref[...].astype(o_ref.dtype)


def prepare_llama_mlp_weights(w_gate, w_up, w_down, *, ti):
    """One-time (load-time) weight re-layout.

    Inputs are in PyTorch nn.Linear layout:
      w_gate, w_up: (I, H);  w_down: (H, I)
    Returns (with I zero-padded up to I_pad, a multiple of ti):
      wgu : (I_pad//ti, H, 2*ti)  tile-contiguous fused gate/up: slab j holds
                                  [gate cols j*ti:(j+1)*ti | up cols same]
      wd_t: (I_pad, H)            down_proj transposed to (in, out);
                                  (ti, H) row-blocks are already contiguous.
    Zero-padded I blocks contribute exactly 0 to the output.
    """
    I, H = w_gate.shape
    assert w_up.shape == (I, H) and w_down.shape == (H, I)
    assert ti % 128 == 0, "ti must be a multiple of 128 (prefer 256/512)"

    I_pad = _round_up(I, ti)
    if I_pad != I:
        pad = I_pad - I
        w_gate = jnp.pad(w_gate, ((0, pad), (0, 0)))
        w_up = jnp.pad(w_up, ((0, pad), (0, 0)))
        w_down = jnp.pad(w_down, ((0, 0), (0, pad)))

    nt = I_pad // ti
    wg_t = w_gate.T.reshape(H, nt, ti)
    wu_t = w_up.T.reshape(H, nt, ti)
    wgu = jnp.concatenate([wg_t, wu_t], axis=2)      # (H, nt, 2*ti)
    wgu = jnp.transpose(wgu, (1, 0, 2))              # (nt, H, 2*ti) tile-contiguous
    wd_t = w_down.T                                  # (I_pad, H)
    return wgu, wd_t


def llama_mlp_forward(x, wgu, wd_t, *, tm=None, vmem_limit_bytes=None):
    """x: (B, S, H); wgu/wd_t from prepare_llama_mlp_weights."""
    B, S, H = x.shape
    nt, H2, two_ti = wgu.shape
    ti = two_ti // 2
    I_pad = nt * ti
    assert H2 == H and wd_t.shape == (I_pad, H)
    assert ti % 128 == 0

    M = B * S
    if vmem_limit_bytes is None:
        vmem_limit_bytes = _default_vmem_limit()
    if tm is None:
        tm, _ = select_llama_mlp_tiles(M, H, I_pad, x.dtype,
                                       vmem_limit_bytes=vmem_limit_bytes, ti=ti)

    # Keep the row tile a multiple of 16 so sublane constraints hold for f32/bf16.
    tm_eff = min(tm, _round_up(M, 16))
    M_pad = _round_up(M, tm_eff)

    x2d = x.reshape(M, H)
    if M_pad != M:
        x2d = jnp.pad(x2d, ((0, M_pad - M), (0, 0)))   # inert zero tail rows

    grid = (M_pad // tm_eff, nt)

    out2d = pl.pallas_call(
        _llama_mlp_kernel,
        out_shape=jax.ShapeDtypeStruct((M_pad, H), x.dtype),
        grid_spec=pltpu.PrefetchScalarGridSpec(
            num_scalar_prefetch=0,
            grid=grid,
            in_specs=[
                # token rows: constant block index across the I axis
                pl.BlockSpec((tm_eff, H), lambda i, j: (i, 0)),
                # fused gate|up weight slab: one contiguous tile per j, streamed
                pl.BlockSpec((1, H, 2 * ti), lambda i, j: (j, 0, 0)),
                # down_proj weight tile: contiguous row block, streamed
                pl.BlockSpec((ti, H), lambda i, j: (j, 0)),
            ],
            out_specs=pl.BlockSpec((tm_eff, H), lambda i, j: (i, 0)),
            scratch_shapes=[pltpu.VMEM((tm_eff, H), jnp.float32)],
        ),
        compiler_params=pltpu.CompilerParams(
            dimension_semantics=("parallel", "arbitrary"),
            vmem_limit_bytes=int(vmem_limit_bytes),
        ),
    )(x2d, wgu, wd_t)

    if M_pad != M:
        out2d = out2d[:M]
    return out2d.reshape(B, S, H)


def llama_mlp(x, w_gate, w_up, w_down, *, tm=None, ti=None, vmem_limit_bytes=None):
    """Convenience wrapper taking raw nn.Linear-layout weights.

    NOTE: in a real model call prepare_llama_mlp_weights ONCE at load time and
    reuse the result; this path re-preps per call (fine for small demos only).
    """
    B, S, H = x.shape
    I = w_gate.shape[0]
    if vmem_limit_bytes is None:
        vmem_limit_bytes = _default_vmem_limit()
    tm_sel, ti_sel = select_llama_mlp_tiles(
        B * S, H, I, x.dtype, vmem_limit_bytes=vmem_limit_bytes, ti=ti)
    if tm is not None:
        tm_sel = tm
    wgu, wd_t = prepare_llama_mlp_weights(w_gate, w_up, w_down, ti=ti_sel)
    return llama_mlp_forward(x, wgu, wd_t, tm=tm_sel,
                             vmem_limit_bytes=vmem_limit_bytes)


def llama_mlp_reference(x, w_gate, w_up, w_down):
    g = jnp.einsum("bsh,ih->bsi", x, w_gate)
    u = jnp.einsum("bsh,ih->bsi", x, w_up)
    h = jax.nn.silu(g) * u
    return jnp.einsum("bsi,hi->bsh", h, w_down)


if __name__ == "__main__":
    # Small TPU-tile-friendly shapes exercising the interesting paths:
    #   M = 200 with TM=128 -> row padding + 2 row tiles on the "parallel" axis
    #   I = 384 with TI=256 -> I padded to 512, 2-step down_proj accumulation
    B, S, H, I = 2, 100, 128, 384
    TM, TI = 128, 256

    key = jax.random.PRNGKey(0)
    kx, kg, ku, kd = jax.random.split(key, 4)

    x = jax.random.normal(kx, (B, S, H), dtype=jnp.float32)
    # nn.Linear weight layout: (out_features, in_features); mlp_bias=False.
    w_gate = jax.random.normal(kg, (I, H), dtype=jnp.float32) * 0.05
    w_up = jax.random.normal(ku, (I, H), dtype=jnp.float32) * 0.05
    w_down = jax.random.normal(kd, (H, I), dtype=jnp.float32) * 0.05

    ref = llama_mlp_reference(x, w_gate, w_up, w_down)

    # Explicit-tile path: one-time weight prep, then the Pallas forward.
    wgu, wd_t = prepare_llama_mlp_weights(w_gate, w_up, w_down, ti=TI)
    out = jax.block_until_ready(llama_mlp_forward(x, wgu, wd_t, tm=TM))
    assert out.shape == (B, S, H)
    assert jnp.allclose(out, ref, atol=2e-4, rtol=2e-4), "mismatch (explicit tiles)"

    # Auto-tuned convenience path (generation-aware tm/ti/VMEM selection).
    out2 = jax.block_until_ready(llama_mlp(x, w_gate, w_up, w_down))
    assert jnp.allclose(out2, ref, atol=2e-4, rtol=2e-4), "mismatch (auto tiles)"

    print("KERNEL_OK")
</pallas_src>

<mosaic_0001>
module attributes {stable_mosaic.version = 11 : i64} {
  func.func @_llama_mlp_kernel(%arg0: i32, %arg1: i32, %arg2: memref<128x128xf32, #tpu.memory_space<vmem>>, %arg3: memref<1x128x512xf32, #tpu.memory_space<vmem>>, %arg4: memref<256x128xf32, #tpu.memory_space<vmem>>, %arg5: memref<128x128xf32, #tpu.memory_space<vmem>>, %arg6: memref<128x128xf32, #tpu.memory_space<vmem>>) attributes {dimension_semantics = [#tpu.dimension_semantics<parallel>, #tpu.dimension_semantics<arbitrary>], iteration_bounds = array<i64: 2, 2>, scalar_prefetch = 0 : i64, scratch_operands = 1 : i64, tpu.core_type = #tpu.core_type<tc>, window_params = [{transform_indices = @transform_0, window_bounds = array<i64: 128, 128>}, {transform_indices = @transform_1, window_bounds = array<i64: 1, 128, 512>}, {transform_indices = @transform_2, window_bounds = array<i64: 256, 128>}, {transform_indices = @transform_3, window_bounds = array<i64: 128, 128>}]} {
    %c0_i32 = arith.constant 0 : i32
    %0 = arith.cmpi eq, %arg1, %c0_i32 : i32
    %1 = arith.extui %0 : i1 to i32
    %c0_i32_0 = arith.constant 0 : i32
    %2 = arith.cmpi ne, %1, %c0_i32_0 : i32
    scf.if %2 {
      %cst_14 = arith.constant 0.000000e+00 : f32
      %24 = vector.broadcast %cst_14 : f32 to vector<128x128xf32>
      %c0_15 = arith.constant 0 : index
      %c0_16 = arith.constant 0 : index
      %25 = vector.load %arg6[%c0_15, %c0_16] : memref<128x128xf32, #tpu.memory_space<vmem>>, vector<128x128xf32>
      tpu.vector_store %arg6[%c0_15, %c0_16], %24 {strides = array<i32>} : memref<128x128xf32, #tpu.memory_space<vmem>>, vector<128x128xf32>,
    } else {
    }
    %c0 = arith.constant 0 : index
    %c0_1 = arith.constant 0 : index
    %3 = vector.load %arg2[%c0, %c0_1] : memref<128x128xf32, #tpu.memory_space<vmem>>, vector<128x128xf32>
    %c0_2 = arith.constant 0 : index
    %c0_3 = arith.constant 0 : index
    %c0_4 = arith.constant 0 : index
    %4 = vector.load %arg3[%c0_2, %c0_3, %c0_4] : memref<1x128x512xf32, #tpu.memory_space<vmem>>, vector<1x128x512xf32>
    %5 = vector.shape_cast %4 : vector<1x128x512xf32> to vector<128x512xf32>
    %cst = arith.constant dense<0.000000e+00> : vector<128x512xf32>
    %6 = tpu.matmul %3, %5, %cst {dimension_numbers = #tpu.dot_dimension_numbers<[1], [0], [0], [1], [0, 0, 1, 1], [], []>} : vector<128x128xf32>, vector<128x512xf32>, vector<128x512xf32> -> vector<128x512xf32>
    %7 = vector.extract_strided_slice %6 {offsets = [0, 0], sizes = [128, 256], strides = [1, 1]} : vector<128x512xf32> to vector<128x256xf32>
    %8 = vector.extract_strided_slice %6 {offsets = [0, 256], sizes = [128, 256], strides = [1, 1]} : vector<128x512xf32> to vector<128x256xf32>
    %9 = arith.negf %7 : vector<128x256xf32>
    %10 = math.exp %9 : vector<128x256xf32>
    %cst_5 = arith.constant 1.000000e+00 : f32
    %11 = vector.broadcast %cst_5 : f32 to vector<128x256xf32>
    %12 = arith.addf %11, %10 : vector<128x256xf32>
    %13 = arith.divf %11, %12 : vector<128x256xf32>
    %14 = arith.mulf %7, %13 : vector<128x256xf32>
    %15 = arith.mulf %14, %8 : vector<128x256xf32>
    %c0_6 = arith.constant 0 : index
    %c0_7 = arith.constant 0 : index
    %16 = vector.load %arg6[%c0_6, %c0_7] : memref<128x128xf32, #tpu.memory_space<vmem>>, vector<128x128xf32>
    %c0_8 = arith.constant 0 : index
    %c0_9 = arith.constant 0 : index
    %17 = vector.load %arg4[%c0_8, %c0_9] : memref<256x128xf32, #tpu.memory_space<vmem>>, vector<256x128xf32>
    %cst_10 = arith.constant dense<0.000000e+00> : vector<128x128xf32>
    %18 = tpu.matmul %15, %17, %cst_10 {dimension_numbers = #tpu.dot_dimension_numbers<[1], [0], [0], [1], [0, 0, 1, 1], [], []>} : vector<128x256xf32>, vector<256x128xf32>, vector<128x128xf32> -> vector<128x128xf32>
    %19 = arith.addf %16, %18 : vector<128x128xf32>
    %c0_11 = arith.constant 0 : index
    %c0_12 = arith.constant 0 : index
    %20 = vector.load %arg6[%c0_11, %c0_12] : memref<128x128xf32, #tpu.memory_space<vmem>>, vector<128x128xf32>
    tpu.vector_store %arg6[%c0_11, %c0_12], %19 {strides = array<i32>} : memref<128x128xf32, #tpu.memory_space<vmem>>, vector<128x128xf32>,
    %c1_i32 = arith.constant 1 : i32
    %21 = arith.cmpi eq, %arg1, %c1_i32 : i32
    %22 = arith.extui %21 : i1 to i32
    %c0_i32_13 = arith.constant 0 : i32
    %23 = arith.cmpi ne, %22, %c0_i32_13 : i32
    scf.if %23 {
      %c0_14 = arith.constant 0 : index
      %c0_15 = arith.constant 0 : index
      %24 = vector.load %arg6[%c0_14, %c0_15] : memref<128x128xf32, #tpu.memory_space<vmem>>, vector<128x128xf32>
      %c0_16 = arith.constant 0 : index
      %c0_17 = arith.constant 0 : index
      %25 = vector.load %arg5[%c0_16, %c0_17] : memref<128x128xf32, #tpu.memory_space<vmem>>, vector<128x128xf32>
      tpu.vector_store %arg5[%c0_16, %c0_17], %24 {strides = array<i32>} : memref<128x128xf32, #tpu.memory_space<vmem>>, vector<128x128xf32>,
    } else {
    }
    return
  }
  func.func @transform_0(%arg0: i32, %arg1: i32) -> (i32, i32) {
    %c0_i32 = arith.constant 0 : i32
    %c0_i32_0 = arith.constant 0 : i32
    return %arg0, %c0_i32 : i32, i32
  }
  func.func @transform_1(%arg0: i32, %arg1: i32) -> (i32, i32, i32) {
    %c0_i32 = arith.constant 0 : i32
    %c0_i32_0 = arith.constant 0 : i32
    %c0_i32_1 = arith.constant 0 : i32
    return %arg1, %c0_i32, %c0_i32_0 : i32, i32, i32
  }
  func.func @transform_2(%arg0: i32, %arg1: i32) -> (i32, i32) {
    %c0_i32 = arith.constant 0 : i32
    %c0_i32_0 = arith.constant 0 : i32
    return %arg1, %c0_i32 : i32, i32
  }
  func.func @transform_3(%arg0: i32, %arg1: i32) -> (i32, i32) {
    %c0_i32 = arith.constant 0 : i32
    %c0_i32_0 = arith.constant 0 : i32
    return %arg0, %c0_i32 : i32, i32
  }
}

</mosaic_0001>

<bundles_post_ra>
// kernel: tpu_custom_call.1
= control target key start
LH: loop header
LB: loop body
LE: loop exit
PB: predicated region body
PF: predicated region fallthrough
CT: control target
= control target key end

     0   :  { %s2842_s0 = inlined_call_operand.hbm [shape: f32[256,128], index: 0, kind: input, shape index: {}]   ;;  %s2843_s1 = inlined_call_operand.hbm [shape: f32[2,128,512], index: 1, kind: input, shape index: {}]   ;;  %s2844_s2 = inlined_call_operand.hbm [shape: f32[512,128], index: 2, kind: input, shape index: {}]   ;;  %s2845_s3 = inlined_call_operand.hbm [shape: f32[256,128], index: 3, kind: output, shape index: {}]  }
   0x1   :  { %2859 = sst [smem:[#allocation19_spill]] %s2843_s1 }
   0x2   :  { %2860 = sst [smem:[#allocation20_spill]] %s2845_s3 }
   0x3   :  { %8 = vsyncpa [#allocation4], 0 }
   0x4   :  { %10 = vsyncpa [#allocation4 + $0x1], 0 }
   0x5   :  { %11 = vsyncpa [#allocation7], 0 }
   0x6   :  { %13 = vsyncpa [#allocation7 + $0x1], 0 }
   0x7   :  { %14 = vsyncpa [#allocation5], 0 }
   0x8   :  { %16 = vsyncpa [#allocation5 + $0x1], 0  ;;  %s2112_s12 = smov 0   ;;  %s2114_s13 = smov 0  }
   0x9   :  { %s2116_s14 = smov 0   ;;  %s2118_s15 = smov 0  }
   0xa   :  { %s2120_s16 = smov 0   ;;  %s2122_s17 = smov 0  }
   0xb   :  { %s2124_s18 = smov 0   ;;  %s2126_s19 = smov 0  }
   0xc   :  { %s2128_s20 = smov 0   ;;  %s2130_s21 = smov 0  }
   0xd   :  { %s2132_s22 = smov 0  }
   0xe LB: > { %2861 = sst [smem:[#allocation13_spill]] %s2046_s14  ;;  %s2166_s23 = sadd.s32 4294967295, %s2078_s22   ;;  %s2078_s22 = sphi %s2132_s22, %s22_s22   ;;  %s2074_s21 = sphi %s2130_s21, %s2893_s21   ;;  %s2070_s20 = sphi %s2128_s20, %s2900_s20   ;;  %s2066_s19 = sphi %s2126_s19, %s2891_s19   ;;  %s2062_s18 = sphi %s2124_s18, %s2899_s18   ;;  %s2058_s17 = sphi %s2122_s17, %s2898_s17   ;;  %s2054_s16 = sphi %s2120_s16, %s2897_s16   ;;  %s2050_s15 = sphi %s2118_s15, %s2896_s15   ;;  %s2046_s14 = sphi %s2116_s14, %s2890_s14   ;;  %s2042_s13 = sphi %s2114_s13, %s2895_s13   ;;  %s2038_s12 = sphi %s2112_s12, %s2894_s12  }
   0xf   : > { %2862 = sst [smem:[#allocation14_spill]] %s2050_s15  ;;  %s31_s24 = sadd.s32 1, %s2070_s20 }
  0x10   : > { %2863 = sst [smem:[#allocation15_spill]] %s2074_s21  ;;  %p2169_p0 = scmp.ge.s32.totalorder %s31_s24, 2 }
  0x11   : > { %p2849_p1 = scmp.eq.s32.totalorder %s2078_s22, 0  ;;  %p2848_p2 = scmp.eq.s32.totalorder %s2166_s23, 0 }
  0x12   : > { %s67_s26 = sadd.s32 1, %s2046_s14  ;;  %s2902_s24 = smov (%p2169_p0, %s31_s24), 0 }
  0x13   : > { %2865 = sst [smem:[#allocation16_spill]] %s2902_s24  ;;  %p74_p3 = scmp.ne.s32.totalorder %s2046_s14, %s2042_s13 }
  0x14   : > { %p80_p4 = scmp.ne.s32.totalorder %s2042_s13, %s2038_s12  ;;  %s64_s27 = ssub.s32 %s2070_s20, %s2902_s24 }
  0x15   : > { %p65_p5 = scmp.eq.s32.totalorder %s64_s27, 0  ;;  %p76_p6 = por %p74_p3, %p2849_p1 }
  0x16   : > { %p2189_p7 = por %p80_p4, %p2848_p2  ;;  %p2847_p8 = scmp.lt.s32.totalorder %s2078_s22, 4 }
  0x17   : > { %s2195_s29 = scalar_select %p65_p5, %s2046_s14, %s67_s26  }
  0x18   : > { %s2866_s28 = scalar_select %p2189_p7, 1, 0 }
  0x19   : > { %2867 = sst [smem:[#allocation17_spill]] %s2195_s29  ;;  %s177_s30 = sand.u32 1, %s2078_s22  }
  0x1a   : > { %s179_s4 = sand.u32 1, %s2046_s14   ;;  %s1419_s6 = sshll.u32 %s2070_s20, 13 }
  0x1b   : > { %s1368_s5 = sshll.u32 %s179_s4, 9  ;;  %s2868_s1 = sld [smem:[#allocation19_spill]] }
  0x1c   : > { %s181_s10 = scalar_lea.vmem [#allocation6], %s1368_s5  ;;  %p2209_p9 = pnand %p2847_p8, %p76_p6 }
  0x1d   : > { %s188_s11 = sshll.u32 %s181_s10, 4  ;;  %s2213_s26 = sshll.u32 %s179_s4, 8  ;;  %s2205_s11 = int_to_ptr.vmem [resolvable:$true] %s188_s11 }
  0x1e   : > { %s2215_s27 = scalar_lea.sflag [#allocation7], %s177_s30  ;;  %p2856_p11 = pneg %p2209_p9 }
  0x21   : > { %s2203_s9 = scalar_lea.hbm %s2868_s1, %s1419_s6  ;;  %s1867_s8 = scalar_lea.hbm %s2868_s1, 16384 }
  0x22   : > { %s1862_s6 = scalar_lea.hbm %s2203_s9, 8192  ;;  %p1868_p3 = scmp.lt.u32.totalorder %s2203_s9, %s2868_s1 }
  0x23   : > { %p1863_p10 = scmp.ne.s32.totalorder %s2203_s9, %s1862_s6  ;;  %p1869_p4 = scmp.lt.u32.totalorder %s1867_s8, %s1862_s6 }
  0x24   : > { %p1871_p6 = scmp.lt.u32.totalorder %s1862_s6, %s2203_s9 }
  0x25   : > { %p1865_p12 = pnand %p2856_p11, %p1863_p10  ;;  %p1870_p5 = por %p1869_p4, %p1868_p3 }
  0x27   : > { %p1866_p13 = pneg %p1865_p12  ;;  %p1872_p8 = por %p1871_p6, %p1870_p5 }
  0x29   : > { %p1873_p2 = pnand %p1872_p8, %p1866_p13 }
  0x2b   : > { %1876 = shalt.err (!%p1873_p2)
}
  0x2c   : > { %s1877_s30 = scalar_lea.vmem %s2205_s11, 8192  ;;  %s2080_s4 = smov [#allocation6]  }
  0x2d   : > { %p1878_p10 = scmp.ne.s32.totalorder %s2205_s11, %s1877_s30  ;;  %s1882_s5 = sshll.u32 %s2080_s4, 4  ;;  %s1883_s5 = int_to_ptr.vmem [resolvable:$false] %s1882_s5 }
  0x2e   : > { %s1884_s24 = scalar_lea.vmem %s1883_s5, 16384  ;;  %p1885_p7 = scmp.lt.s32.totalorder %s2205_s11, %s1883_s5 }
  0x2f   : > { %p1880_p12 = pnand %p1878_p10, %p2856_p11  ;;  %p1886_p3 = scmp.lt.s32.totalorder %s1884_s24, %s1877_s30 }
  0x31   : > { %p1881_p1 = pneg %p1880_p12  ;;  %p1887_p4 = por %p1886_p3, %p1885_p7 }
  0x33   : > { %p1888_p5 = pnand %p1887_p4, %p1881_p1 }
  0x35   : > { %1891 = shalt.err (!%p1888_p5)
}
  0x36   : > { %s2081_s6 = smov 512   ;;  %s2082_s7 = smov 32  }
  0x37   : > { %1628 = dma.hbm_to_vmem [thread:$0]  (!%p2209_p9), %s2203_s9, 8192, %s2205_s11, %s2215_s27, %s2081_s6, %s2081_s6, %s2082_s7  }
  0x38   : > { %p1374_p1 = scmp.ge.s32.totalorder %s2078_s22, 1  ;;  %s202_s8 = scalar_lea.vmem [#allocation8], %s2213_s26 }
  0x39   : > { %s2245_s10 = sshll.u32 %s202_s8, 4  ;;  %p217_p2 = scmp.lt.s32.totalorder %s2078_s22, 5  ;;  %s2347_s10 = int_to_ptr.vmem [resolvable:$true] %s2245_s10 }
  0x3a   : > { %s1362_s4 = sadd.s32 4294967294, %s2078_s22   ;;  %s34_s5 = sadd.s32 1, %s2074_s21 }
  0x3b   : > { %p2248_p7 = pnand %p1374_p1, %p217_p2  ;;  %s41_s24 = sadd.s32 1, %s2058_s17 }
  0x3c   : > { %s2904_s5 = smov (!%p2169_p0, %s34_s5), %s2074_s21  ;;  %p48_p8 = scmp.ne.s32.totalorder %s2058_s17, %s2054_s16 }
  0x3d   : > { %s2870_s30 = scalar_select %p2248_p7, 1, 0 }
  0x3e   : > { %p54_p13 = scmp.ne.s32.totalorder %s2054_s16, %s2050_s15  ;;  %p36_p6 = scmp.ge.s32.totalorder %s2904_s5, 2 }
  0x3f   : > { %p130_p10 = scmp.eq.s32.totalorder %s2166_s23, 3  ;;  %p2871_p12 = scmp.eq.s32.totalorder %s2078_s22, 0 }
  0x40   : > { %p2873_p4 = scmp.eq.s32.totalorder %s2166_s23, 0  ;;  %s2906_s5 = smov (%p36_p6, %s2904_s5), 0 }
  0x41   : > { %p2265_p3 = por %p2871_p12, %p48_p8  ;;  %2875 = sst [smem:[#allocation18_spill]] %s2906_s5 }
  0x42   : > { %p2271_p5 = por %p2873_p4, %p54_p13  ;;  %p2277_p0 = por %p130_p10, %p48_p8 }
  0x43   : > { %p136_p1 = scmp.eq.s32.totalorder %s1362_s4, 3  ;;  %s38_s26 = ssub.s32 %s2074_s21, %s2906_s5 }
  0x44   : > { %s2874_s11 = scalar_select %p2271_p5, 1, 0 }
  0x45   : > { %s2876_s25 = scalar_select %p2277_p0, 1, 0 }
  0x46   : > { %s156_s6 = sand.u32 1, %s2058_s17   ;;  %p39_p2 = scmp.eq.s32.totalorder %s38_s26, 0 }
  0x47   : > { %p2284_p12 = por %p136_p1, %p54_p13  ;;  %s1365_s8 = sshll.u32 %s156_s6, 7 }
  0x48   : > { %s2289_s1 = scalar_select %p39_p2, %s2058_s17, %s41_s24  }
  0x49   : > { %s2877_s7 = scalar_select %p2284_p12, 1, 0 }
  0x4a   : > { %s1418_s29 = sshll.u32 %s2074_s21, 11  ;;  %s160_s4 = scalar_lea.vmem [#allocation3], %s1365_s8 }
  0x4b   : > { %s2295_s3 = scalar_lea.hbm %s2842_s0, %s1418_s29  ;;  %s167_s5 = sshll.u32 %s160_s4, 4  ;;  %s2297_s5 = int_to_ptr.vmem [resolvable:$true] %s167_s5 }
  0x4c   : > { %p2878_p8 = scmp.lt.s32.totalorder %s2078_s22, 4  ;;  %s1420_s24 = sshll.u32 %s2070_s20, 12 }
  0x4d   : > { %s2308_s14 = scalar_lea.sflag [#allocation4], %s156_s6  ;;  %s1892_s15 = scalar_lea.hbm %s2295_s3, 2048 }
  0x4e   : > { %p2303_p13 = pnand %p2878_p8, %p2265_p3  ;;  %p1893_p6 = scmp.ne.s32.totalorder %s2295_s3, %s1892_s15 }
  0x4f   : > { %s1897_s8 = scalar_lea.hbm %s2842_s0, 4096  ;;  %p1898_p3 = scmp.lt.u32.totalorder %s2295_s3, %s2842_s0 }
  0x50   : > { %p1894_p10 = pneg %p2303_p13  ;;  %p1899_p2 = scmp.lt.u32.totalorder %s1897_s8, %s1892_s15 }
  0x51   : > { %p1901_p11 = scmp.lt.u32.totalorder %s1892_s15, %s2295_s3 }
  0x52   : > { %p1895_p4 = pnand %p1894_p10, %p1893_p6  ;;  %p1900_p8 = por %p1899_p2, %p1898_p3 }
  0x54   : > { %p1896_p1 = pneg %p1895_p4  ;;  %p1902_p12 = por %p1901_p11, %p1900_p8 }
  0x56   : > { %p1903_p0 = pnand %p1902_p12, %p1896_p1 }
  0x58   : > { %1906 = shalt.err (!%p1903_p0)
}
  0x59   : > { %s1907_s6 = scalar_lea.vmem %s2297_s5, 2048  ;;  %s2083_s29 = smov [#allocation3]  }
  0x5a   : > { %p1908_p6 = scmp.ne.s32.totalorder %s2297_s5, %s1907_s6  ;;  %s1912_s9 = sshll.u32 %s2083_s29, 4  ;;  %s1913_s9 = int_to_ptr.vmem [resolvable:$false] %s1912_s9 }
  0x5b   : > { %s1914_s21 = scalar_lea.vmem %s1913_s9, 4096  ;;  %p1915_p7 = scmp.lt.s32.totalorder %s2297_s5, %s1913_s9 }
  0x5c   : > { %p1910_p4 = pnand %p1908_p6, %p1894_p10  ;;  %p1916_p3 = scmp.lt.s32.totalorder %s1914_s21, %s1907_s6 }
  0x5e   : > { %p1911_p5 = pneg %p1910_p4  ;;  %p1917_p2 = por %p1916_p3, %p1915_p7 }
  0x60   : > { %p1918_p11 = pnand %p1917_p2, %p1911_p5 }
  0x62   : > { %1921 = shalt.err (!%p1918_p11)
}
  0x63   : > { %s2084_s15 = smov 128   ;;  %s2085_s8 = smov 8  }
  0x64   : > { %1625 = dma.hbm_to_vmem [thread:$0]  (!%p2303_p13), %s2295_s3, 2048, %s2297_s5, %s2308_s14, %s2084_s15, %s2084_s15, %s2085_s8  }
  0x65   : > { %s2344_s29 = scalar_lea.hbm %s2844_s2, %s1420_s24  ;;  %p2880_p5 = pneg %p2209_p9 }
  0x66   : > { %s1922_s9 = scalar_lea.hbm %s2344_s29, 4096  ;;  %s1927_s5 = scalar_lea.hbm %s2844_s2, 8192 }
  0x67   : > { %p1923_p7 = scmp.ne.s32.totalorder %s2344_s29, %s1922_s9  ;;  %p1928_p13 = scmp.lt.u32.totalorder %s2344_s29, %s2844_s2 }
  0x68   : > { %p1929_p10 = scmp.lt.u32.totalorder %s1927_s5, %s1922_s9  ;;  %p1931_p8 = scmp.lt.u32.totalorder %s1922_s9, %s2344_s29 }
  0x69   : > { %p1925_p0 = pnand %p1923_p7, %p2880_p5 }
  0x6a   : > { %p1930_p1 = por %p1929_p10, %p1928_p13 }
  0x6b   : > { %p1926_p12 = pneg %p1925_p0 }
  0x6c   : > { %p1932_p6 = por %p1931_p8, %p1930_p1 }
  0x6e   : > { %p1933_p4 = pnand %p1932_p6, %p1926_p12 }
  0x70   : > { %1936 = shalt.err (!%p1933_p4)
}
  0x71   : > { %s1937_s24 = scalar_lea.vmem %s2347_s10, 4096  ;;  %p2881_p2 = pmov %p2880_p5 }
  0x72   : > { %p1938_p3 = scmp.ne.s32.totalorder %s2347_s10, %s1937_s24  ;;  %s2086_s4 = smov [#allocation8]  }
  0x73   : > { %s1942_s6 = sshll.u32 %s2086_s4, 4  ;;  %s1943_s6 = int_to_ptr.vmem [resolvable:$false] %s1942_s6 }
  0x74   : > { %p1940_p11 = pnand %p1938_p3, %p2881_p2  ;;  %s1944_s26 = scalar_lea.vmem %s1943_s6, 8192 }
  0x75   : > { %p1945_p5 = scmp.lt.s32.totalorder %s2347_s10, %s1943_s6  ;;  %p1946_p0 = scmp.lt.s32.totalorder %s1944_s26, %s1937_s24 }
  0x76   : > { %p1941_p7 = pneg %p1940_p11 }
  0x77   : > { %p1947_p13 = por %p1946_p0, %p1945_p5 }
  0x79   : > { %p1948_p10 = pnand %p1947_p13, %p1941_p7 }
  0x7b   : > { %1951 = shalt.err (!%p1948_p10)
}
  0x7c   : > { %1631 = dma.hbm_to_vmem [thread:$0]  (!%p2209_p9), %s2344_s29, 4096, %s2347_s10, %s2215_s27, %s2084_s15, %s2084_s15, %s2085_s8  }
  0x7d   : > { %p2882_p12 = scmp.ne.s32.totalorder %s2870_s30, 0 }
  0x7e   : > { %s2379_s9 = sand.u32 (!%p2882_p12), 1, %s2054_s16   ;;  %p2883_p1 = scmp.ne.s32.totalorder (!%p2882_p12), %s2874_s11, 0 }
  0x7f   : > { %221 = sbr.rel (%p2882_p12) target bundleno = 771 (0x303), region = 32  ;;  %s1375_s3 = sshll.u32 (!%p2882_p12), %s2379_s9, 7 }
  0x80   : > { %s224_s5 = scalar_lea.sflag (!%p2882_p12), [#allocation4], %s2379_s9  ;;  %s2383_s14 = scalar_lea.vmem (!%p2882_p12), [#allocation3], %s1375_s3 }
  0x86   : > { %2025 = dma.done.wait (%p2883_p1), %s224_s5, 2048  }
  0x87   : > { %2027 = vsyncadd (%p2883_p1), %s224_s5, 4294965248  ;;  %s232_s12 = sand.u32 1, %s2166_s23   ;;  %s234_s27 = sand.u32 1, %s2042_s13  }
  0x88   : > { %s1376_s10 = sshll.u32 %s234_s27, 9  ;;  %s233_s30 = scalar_lea.sflag [#allocation7], %s232_s12 }
  0x89   : > { %s2391_s15 = scalar_lea.vmem [#allocation6], %s1376_s10  ;;  %p2884_p9 = scmp.ne.s32.totalorder %s2866_s28, 0 }
  0x8b   : > { %2029 = dma.done.wait (%p2884_p9), %s233_s30, 12288  }
  0x8c   : > { %2031 = vsyncadd (%p2884_p9), %s233_s30, 4294955008  ;;  %s1377_s8 = sshll.u32 %s234_s27, 8  ;;  %s2399_s21 = scalar_lea.vmem [#allocation9], %s1375_s3 }
  0x8d   : > { %s2397_s29 = scalar_lea.vmem [#allocation8], %s1377_s8  ;;  %p1379_p8 = scmp.ne.s32.totalorder %s2062_s18, 0 }
  0x8e   : > { %v2087_v0 = vmov (!%p1379_p8), 0.0  }
  0x8f   : > { %284 = sbr.rel (%p1379_p8) target bundleno = 151 (0x97), region = 48  ;;  %285 = vst [vmem:[#allocation2] sm:$0xff] (!%p1379_p8), %v2087_v0  ;;  %286 = vst [vmem:[#allocation2 + $0x8] sm:$0xff] (!%p1379_p8), %v2087_v0 }
  0x90   : > { %287 = vst [vmem:[#allocation2 + $0x10] sm:$0xff] (!%p1379_p8), %v2087_v0  ;;  %288 = vst [vmem:[#allocation2 + $0x18] sm:$0xff] (!%p1379_p8), %v2087_v0 }
  0x91   : > { %289 = vst [vmem:[#allocation2 + $0x20] sm:$0xff] (!%p1379_p8), %v2087_v0  ;;  %290 = vst [vmem:[#allocation2 + $0x28] sm:$0xff] (!%p1379_p8), %v2087_v0 }
  0x92   : > { %291 = vst [vmem:[#allocation2 + $0x30] sm:$0xff] (!%p1379_p8), %v2087_v0  ;;  %292 = vst [vmem:[#allocation2 + $0x38] sm:$0xff] (!%p1379_p8), %v2087_v0 }
  0x93   : > { %293 = vst [vmem:[#allocation2 + $0x40] sm:$0xff] (!%p1379_p8), %v2087_v0  ;;  %294 = vst [vmem:[#allocation2 + $0x48] sm:$0xff] (!%p1379_p8), %v2087_v0 }
  0x94   : > { %295 = vst [vmem:[#allocation2 + $0x50] sm:$0xff] (!%p1379_p8), %v2087_v0  ;;  %296 = vst [vmem:[#allocation2 + $0x58] sm:$0xff] (!%p1379_p8), %v2087_v0 }
  0x95   : > { %297 = vst [vmem:[#allocation2 + $0x60] sm:$0xff] (!%p1379_p8), %v2087_v0  ;;  %298 = vst [vmem:[#allocation2 + $0x68] sm:$0xff] (!%p1379_p8), %v2087_v0 }
  0x96   : > { %299 = vst [vmem:[#allocation2 + $0x70] sm:$0xff] %v2087_v0  ;;  %300 = vst [vmem:[#allocation2 + $0x78] sm:$0xff] %v2087_v0 }
  0x97 PF: > { %v318_v1 = vld [vmem:[%s2391_s15 + $0x8] sm:$0xff]  ;;  %v317_v3 = vld [vmem:[%s2391_s15] sm:$0xff]  ;;  %v2088_v8 = vmov 0.0   ;;  %v320_v49 = vld [vmem:[%s2391_s15 + $0x18] sm:$0xff]  ;;  %p1412_p6 = scmp.ne.s32.totalorder %s2062_s18, 1 }
  0x98   : > { %v322_v2 = vld [vmem:[%s2391_s15 + $0x28] sm:$0xff]  ;;  %v321_v5 = vld [vmem:[%s2391_s15 + $0x20] sm:$0xff]  ;;  %445 = vmatprep.mubr.f32.mxu0 %v2088_v8  ;;  %493 = vmatprep.mubr.f32.mxu1 %v2088_v8  ;;  %v324_v50 = vld [vmem:[%s2391_s15 + $0x38] sm:$0xff] }
  0x99   : > { %v1502_v4 = vpack.c.bf16 %v322_v2, %v318_v1  ;;  %v326_v6 = vld [vmem:[%s2391_s15 + $0x48] sm:$0xff]  ;;  %v1504_v9 = vpack.c.bf16 %v321_v5, %v317_v3  ;;  %v325_v11 = vld [vmem:[%s2391_s15 + $0x40] sm:$0xff]  ;;  %v1534_v52 = vpack.c.bf16 %v324_v50, %v320_v49  ;;  %v319_v53 = vld [vmem:[%s2391_s15 + $0x10] sm:$0xff] }
  0x9a   : > { %v330_v7 = vld [vmem:[%s2391_s15 + $0x68] sm:$0xff]  ;;  %v329_v12 = vld [vmem:[%s2391_s15 + $0x60] sm:$0xff]  ;;  %v323_v54 = vld [vmem:[%s2391_s15 + $0x30] sm:$0xff] }
  0x9b   : > { %v1506_v10 = vpack.c.bf16 %v330_v7, %v326_v6  ;;  %v334_v13 = vld [vmem:[%s2391_s15 + $0x88] sm:$0xff]  ;;  %1503 = vmatprep.subr.bf16.mxu0 %v1502_v4  ;;  %1598 = vmatprep.subr.bf16.mxu1 %v1502_v4  ;;  %v1508_v15 = vpack.c.bf16 %v329_v12, %v325_v11  ;;  %v333_v17 = vld [vmem:[%s2391_s15 + $0x80] sm:$0xff]  ;;  %v328_v55 = vld [vmem:[%s2391_s15 + $0x58] sm:$0xff]  ;;  %v1536_v59 = vpack.c.bf16 %v323_v54, %v319_v53 }
  0x9c   : > { %v338_v14 = vld [vmem:[%s2391_s15 + $0xa8] sm:$0xff]  ;;  %1505 = vmatpush1.bf16.msra.mxu0 %v1504_v9  ;;  %1606 = vmatpush1.bf16.msra.mxu1 %v1504_v9  ;;  %v337_v18 = vld [vmem:[%s2391_s15 + $0xa0] sm:$0xff]  ;;  %v332_v56 = vld [vmem:[%s2391_s15 + $0x78] sm:$0xff] }
  0x9d   : > { %1507 = vmatprep.subr.bf16.mxu0 %v1506_v10  ;;  %1599 = vmatprep.subr.bf16.mxu1 %v1506_v10  ;;  %v1510_v16 = vpack.c.bf16 %v338_v14, %v334_v13  ;;  %v342_v19 = vld [vmem:[%s2391_s15 + $0xc8] sm:$0xff]  ;;  %v1512_v21 = vpack.c.bf16 %v337_v18, %v333_v17  ;;  %v341_v23 = vld [vmem:[%s2391_s15 + $0xc0] sm:$0xff]  ;;  %v1538_v60 = vpack.c.bf16 %v332_v56, %v328_v55  ;;  %v327_v61 = vld [vmem:[%s2391_s15 + $0x50] sm:$0xff] }
  0x9e   : > { %v346_v20 = vld [vmem:[%s2391_s15 + $0xe8] sm:$0xff]  ;;  %v345_v24 = vld [vmem:[%s2391_s15 + $0xe0] sm:$0xff]  ;;  %v331_v62 = vld [vmem:[%s2391_s15 + $0x70] sm:$0xff] }
  0x9f   : > { %v1514_v22 = vpack.c.bf16 %v346_v20, %v342_v19  ;;  %v350_v25 = vld [vmem:[%s2391_s15 + $0x108] sm:$0xff]  ;;  %v1516_v27 = vpack.c.bf16 %v345_v24, %v341_v23  ;;  %v349_v29 = vld [vmem:[%s2391_s15 + $0x100] sm:$0xff]  ;;  %v336_v63 = vld [vmem:[%s2391_s15 + $0x98] sm:$0xff]  ;;  %v1540_v3 = vpack.c.bf16 %v331_v62, %v327_v61 }
  0xa0   : > { %1509 = vmatpush1.bf16.msra.mxu0 %v1508_v15  ;;  %1607 = vmatpush1.bf16.msra.mxu1 %v1508_v15  ;;  %v354_v26 = vld [vmem:[%s2391_s15 + $0x128] sm:$0xff]  ;;  %v353_v30 = vld [vmem:[%s2391_s15 + $0x120] sm:$0xff]  ;;  %v340_v0 = vld [vmem:[%s2391_s15 + $0xb8] sm:$0xff] }
  0xa1   : > { %1511 = vmatprep.subr.bf16.mxu0 %v1510_v16  ;;  %1600 = vmatprep.subr.bf16.mxu1 %v1510_v16  ;;  %v1518_v28 = vpack.c.bf16 %v354_v26, %v350_v25  ;;  %v358_v31 = vld [vmem:[%s2391_s15 + $0x148] sm:$0xff]  ;;  %v1520_v33 = vpack.c.bf16 %v353_v30, %v349_v29  ;;  %v357_v35 = vld [vmem:[%s2391_s15 + $0x140] sm:$0xff]  ;;  %v1542_v4 = vpack.c.bf16 %v340_v0, %v336_v63  ;;  %v335_v5 = vld [vmem:[%s2391_s15 + $0x90] sm:$0xff] }
  0xa2   : > { %v362_v32 = vld [vmem:[%s2391_s15 + $0x168] sm:$0xff]  ;;  %v361_v36 = vld [vmem:[%s2391_s15 + $0x160] sm:$0xff]  ;;  %v339_v6 = vld [vmem:[%s2391_s15 + $0xb0] sm:$0xff] }
  0xa3   : > { %v1522_v34 = vpack.c.bf16 %v362_v32, %v358_v31  ;;  %v366_v37 = vld [vmem:[%s2391_s15 + $0x188] sm:$0xff]  ;;  %v1524_v39 = vpack.c.bf16 %v361_v36, %v357_v35  ;;  %v365_v41 = vld [vmem:[%s2391_s15 + $0x180] sm:$0xff]  ;;  %v344_v7 = vld [vmem:[%s2391_s15 + $0xd8] sm:$0xff]  ;;  %v1544_v12 = vpack.c.bf16 %v339_v6, %v335_v5 }
  0xa4   : > { %1513 = vmatpush1.bf16.msra.mxu0 %v1512_v21  ;;  %1608 = vmatpush1.bf16.msra.mxu1 %v1512_v21  ;;  %v370_v38 = vld [vmem:[%s2391_s15 + $0x1a8] sm:$0xff]  ;;  %v369_v42 = vld [vmem:[%s2391_s15 + $0x1a0] sm:$0xff]  ;;  %v348_v9 = vld [vmem:[%s2391_s15 + $0xf8] sm:$0xff] }
  0xa5   : > { %1515 = vmatprep.subr.bf16.mxu0 %v1514_v22  ;;  %1601 = vmatprep.subr.bf16.mxu1 %v1514_v22  ;;  %v1526_v40 = vpack.c.bf16 %v370_v38, %v366_v37  ;;  %v374_v43 = vld [vmem:[%s2391_s15 + $0x1c8] sm:$0xff]  ;;  %v1528_v45 = vpack.c.bf16 %v369_v42, %v365_v41  ;;  %v373_v47 = vld [vmem:[%s2391_s15 + $0x1c0] sm:$0xff]  ;;  %v2470_v10 = vld [vmem:[%s2383_s14 + $0x10] sm:$0xff]  ;;  %v1546_v13 = vpack.c.bf16 %v348_v9, %v344_v7 }
  0xa6   : > { %v378_v44 = vld [vmem:[%s2391_s15 + $0x1e8] sm:$0xff]  ;;  %v377_v48 = vld [vmem:[%s2391_s15 + $0x1e0] sm:$0xff]  ;;  %v2473_v11 = vld [vmem:[%s2383_s14 + $0x50] sm:$0xff] }
  0xa7   : > { %v1530_v46 = vpack.c.bf16 %v378_v44, %v374_v43  ;;  %v1532_v51 = vpack.c.bf16 %v377_v48, %v373_v47  ;;  %v2443_v57 = vld [vmem:[%s2383_s14] sm:$0xff]  ;;  %v2456_v1 = vld [vmem:[%s2383_s14 + $0x8] sm:$0xff]  ;;  %v343_v14 = vld [vmem:[%s2391_s15 + $0xd0] sm:$0xff] }
  0xa8   : > { %1517 = vmatpush1.bf16.msra.mxu0 %v1516_v27  ;;  %1609 = vmatpush1.bf16.msra.mxu1 %v1516_v27  ;;  %v2446_v58 = vld [vmem:[%s2383_s14 + $0x40] sm:$0xff]  ;;  %v2459_v2 = vld [vmem:[%s2383_s14 + $0x48] sm:$0xff]  ;;  %v347_v15 = vld [vmem:[%s2391_s15 + $0xf0] sm:$0xff] }
  0xa9   : > { %1519 = vmatprep.subr.bf16.mxu0 %v1518_v28  ;;  %1602 = vmatprep.subr.bf16.mxu1 %v1518_v28  ;;  %v352_v16 = vld [vmem:[%s2391_s15 + $0x118] sm:$0xff]  ;;  %v1548_v20 = vpack.c.bf16 %v347_v15, %v343_v14  ;;  %v351_v22 = vld [vmem:[%s2391_s15 + $0x110] sm:$0xff]  ;;  %v305_v26 = vld [vmem:[%s2383_s14 + $0x20] sm:$0xff] }
  0xaa   : > { %v356_v17 = vld [vmem:[%s2391_s15 + $0x138] sm:$0xff]  ;;  %v355_v23 = vld [vmem:[%s2391_s15 + $0x130] sm:$0xff]  ;;  %v2499_v27 = vld [vmem:[%s2383_s14 + $0x60] sm:$0xff] }
  0xab   : > { %v2484_v18 = vld [vmem:[%s2383_s14 + $0x18] sm:$0xff]  ;;  %v1550_v21 = vpack.c.bf16 %v356_v17, %v352_v16  ;;  %v1552_v28 = vpack.c.bf16 %v355_v23, %v351_v22  ;;  %v359_v30 = vld [vmem:[%s2391_s15 + $0x150] sm:$0xff]  ;;  %v314_v35 = vld [vmem:[%s2383_s14 + $0x68] sm:$0xff] }
  0xac   : > { %1521 = vmatpush1.bf16.msra.mxu0 %v1520_v33  ;;  %1610 = vmatpush1.bf16.msra.mxu1 %v1520_v33  ;;  %v2487_v19 = vld [vmem:[%s2383_s14 + $0x58] sm:$0xff]  ;;  %v363_v31 = vld [vmem:[%s2391_s15 + $0x170] sm:$0xff]  ;;  %v975_v54 = vld [vmem:[%s2397_s29] sm:$0xff] }
  0xad   : > { %1523 = vmatprep.subr.bf16.mxu0 %v1522_v34  ;;  %1603 = vmatprep.subr.bf16.mxu1 %v1522_v34  ;;  %v360_v24 = vld [vmem:[%s2391_s15 + $0x158] sm:$0xff]  ;;  %v306_v34 = vld [vmem:[%s2383_s14 + $0x28] sm:$0xff]  ;;  %v1556_v36 = vpack.c.bf16 %v363_v31, %v359_v30  ;;  %v367_v38 = vld [vmem:[%s2391_s15 + $0x190] sm:$0xff] }
  0xae   : > { %v364_v25 = vld [vmem:[%s2391_s15 + $0x178] sm:$0xff]  ;;  %v307_v42 = vld [vmem:[%s2383_s14 + $0x30] sm:$0xff]  ;;  %v976_v55 = vld [vmem:[%s2397_s29 + $0x8] sm:$0xff] }
  0xaf   : > { %v1554_v29 = vpack.c.bf16 %v364_v25, %v360_v24  ;;  %v368_v32 = vld [vmem:[%s2391_s15 + $0x198] sm:$0xff]  ;;  %v315_v43 = vld [vmem:[%s2383_s14 + $0x70] sm:$0xff]  ;;  %v1568_v56 = vpack.c.bf16 %v976_v55, %v975_v54  ;;  %v995_v63 = vld [vmem:[%s2397_s29 + $0xa0] sm:$0xff] }
  0xb0   : > { %1525 = vmatpush1.bf16.msra.mxu0 %v1524_v39  ;;  %1611 = vmatpush1.bf16.msra.mxu1 %v1524_v39  ;;  %v372_v33 = vld [vmem:[%s2391_s15 + $0x1b8] sm:$0xff]  ;;  %v371_v39 = vld [vmem:[%s2391_s15 + $0x1b0] sm:$0xff]  ;;  %v983_v14 = vld [vmem:[%s2397_s29 + $0x40] sm:$0xff] }
  0xb1   : > { %1527 = vmatprep.subr.bf16.mxu0 %v1526_v40  ;;  %1604 = vmatprep.subr.bf16.mxu1 %v1526_v40  ;;  %v1558_v37 = vpack.c.bf16 %v372_v33, %v368_v32  ;;  %v376_v40 = vld [vmem:[%s2391_s15 + $0x1d8] sm:$0xff]  ;;  %v1560_v44 = vpack.c.bf16 %v371_v39, %v367_v38  ;;  %v379_v47 = vld [vmem:[%s2391_s15 + $0x1f0] sm:$0xff]  ;;  %v984_v15 = vld [vmem:[%s2397_s29 + $0x48] sm:$0xff] }
  0xb2   : > { %v380_v41 = vld [vmem:[%s2391_s15 + $0x1f8] sm:$0xff]  ;;  %v981_v7 = vld [vmem:[%s2397_s29 + $0x30] sm:$0xff]  ;;  %v1584_v16 = vpack.c.bf16 %v984_v15, %v983_v14  ;;  %v1003_v23 = vld [vmem:[%s2397_s29 + $0xe0] sm:$0xff] }
  0xb3   : > { %v308_v48 = vld [vmem:[%s2383_s14 + $0x38] sm:$0xff]  ;;  %v1001_v17 = vld [vmem:[%s2397_s29 + $0xd0] sm:$0xff]  ;;  %v1004_v24 = vld [vmem:[%s2397_s29 + $0xe8] sm:$0xff] }
  0xb4   : > { %1529 = vmatpush1.bf16.msra.mxu0 %v1528_v45  ;;  %1612 = vmatpush1.bf16.msra.mxu1 %v1528_v45  ;;  %v1562_v45 = vpack.c.bf16 %v380_v41, %v376_v40  ;;  %v316_v49 = vld [vmem:[%s2383_s14 + $0x78] sm:$0xff]  ;;  %v1590_v25 = vpack.c.bf16 %v1004_v24, %v1003_v23  ;;  %v989_v32 = vld [vmem:[%s2397_s29 + $0x70] sm:$0xff] }
  0xb5   : > { %1531 = vmatprep.subr.bf16.mxu0 %v1530_v46  ;;  %1605 = vmatprep.subr.bf16.mxu1 %v1530_v46  ;;  %v375_v46 = vld [vmem:[%s2391_s15 + $0x1d0] sm:$0xff]  ;;  %v978_v61 = vld [vmem:[%s2397_s29 + $0x18] sm:$0xff] }
  0xb6   : > { %v1564_v50 = vpack.c.bf16 %v379_v47, %v375_v46  ;;  %v998_v5 = vld [vmem:[%s2397_s29 + $0xb8] sm:$0xff] }
  0xb7   : > { %v982_v9 = vld [vmem:[%s2397_s29 + $0x38] sm:$0xff] }
  0xb8   : > { %1533 = vmatpush1.bf16.msra.mxu0 %v1532_v51  ;;  %1613 = vmatpush1.bf16.msra.mxu1 %v1532_v51  ;;  %v991_v51 = vld [vmem:[%s2397_s29 + $0x80] sm:$0xff]  ;;  %v1006_v30 = vld [vmem:[%s2397_s29 + $0xf8] sm:$0xff] }
  0xb9   : > { %1535 = vmatprep.subr.bf16.mxu1 %v1534_v52  ;;  %v992_v52 = vld [vmem:[%s2397_s29 + $0x88] sm:$0xff]  ;;  %v990_v33 = vld [vmem:[%s2397_s29 + $0x78] sm:$0xff] }
  0xba   : > { %v1566_v53 = vpack.c.bf16 %v992_v52, %v991_v51 }
  0xbb   : > { %446 = vmatmul.mubr.f32.vlgmr.msra.gmra.mrb[0].mxu0 %v2443_v57  ;;  %494 = vmatmul.mubr.f32.vlgmr.msra.gmra.mrb[0].mxu1 %v2446_v58 }
  0xbc   : > { %1537 = vmatpush1.bf16.msra.mxu1 %v1536_v59  ;;  %451 = vmatprep.mubr.f32.mxu0 %v2088_v8 }
  0xbd   : > { %499 = vmatprep.mubr.f32.mxu1 %v2088_v8  ;;  %1539 = vmatprep.subr.bf16.mxu1 %v1538_v60  ;;  %v977_v60 = vld [vmem:[%s2397_s29 + $0x10] sm:$0xff] }
  0xbe   : > { %1567 = vmatprep.subr.bf16.mxu0 %v1566_v53  ;;  %v1572_v62 = vpack.c.bf16 %v978_v61, %v977_v60 }
  0xbf   : > { %452 = vmatmul.mubr.f32.gmra.mrb[2].mxu0 %v2456_v1  ;;  %500 = vmatmul.mubr.f32.gmra.mrb[2].mxu1 %v2459_v2 }
  0xc0   : > { %1541 = vmatpush1.bf16.msra.mxu1 %v1540_v3  ;;  %457 = vmatprep.mubr.f32.mxu0 %v2088_v8 }
  0xc1   : > { %505 = vmatprep.mubr.f32.mxu1 %v2088_v8  ;;  %1543 = vmatprep.subr.bf16.mxu1 %v1542_v4  ;;  %v997_v4 = vld [vmem:[%s2397_s29 + $0xb0] sm:$0xff] }
  0xc2   : > { %1569 = vmatpush3.bf16.msra.mxu0 %v1568_v56  ;;  %v1578_v6 = vpack.c.bf16 %v998_v5, %v997_v4 }
  0xc3   : > { %458 = vmatmul.mubr.f32.gmra.mrb[4].mxu0 %v2470_v10  ;;  %506 = vmatmul.mubr.f32.gmra.mrb[4].mxu1 %v2473_v11 }
  0xc4   : > { %1545 = vmatpush1.bf16.msra.mxu1 %v1544_v12  ;;  %463 = vmatprep.mubr.f32.mxu0 %v2088_v8  ;;  %v1000_v12 = vld [vmem:[%s2397_s29 + $0xc8] sm:$0xff] }
  0xc5   : > { %511 = vmatprep.mubr.f32.mxu1 %v2088_v8  ;;  %1547 = vmatprep.subr.bf16.mxu1 %v1546_v13 }
  0xc7   : > { %464 = vmatmul.mubr.f32.gmra.mrb[6].mxu0 %v2484_v18  ;;  %512 = vmatmul.mubr.f32.gmra.mrb[6].mxu1 %v2487_v19 }
  0xc8   : > { %1549 = vmatpush1.bf16.msra.mxu1 %v1548_v20  ;;  %469 = vmatprep.mubr.f32.mxu0 %v2088_v8  ;;  %v985_v20 = vld [vmem:[%s2397_s29 + $0x50] sm:$0xff] }
  0xc9   : > { %517 = vmatprep.mubr.f32.mxu1 %v2088_v8  ;;  %1551 = vmatprep.subr.bf16.mxu1 %v1550_v21  ;;  %v986_v21 = vld [vmem:[%s2397_s29 + $0x58] sm:$0xff] }
  0xca   : > { %v1588_v22 = vpack.c.bf16 %v986_v21, %v985_v20 }
  0xcb   : > { %470 = vmatmul.mubr.f32.gmra.mrb[8].mxu0 %v305_v26  ;;  %518 = vmatmul.mubr.f32.gmra.mrb[8].mxu1 %v2499_v27 }
  0xcc   : > { %1553 = vmatpush1.bf16.msra.mxu1 %v1552_v28  ;;  %475 = vmatprep.mubr.f32.mxu0 %v2088_v8 }
  0xcd   : > { %523 = vmatprep.mubr.f32.mxu1 %v2088_v8  ;;  %1555 = vmatprep.subr.bf16.mxu1 %v1554_v29  ;;  %v1005_v29 = vld [vmem:[%s2397_s29 + $0xf0] sm:$0xff] }
  0xce   : > { %v1594_v31 = vpack.c.bf16 %v1006_v30, %v1005_v29 }
  0xcf   : > { %476 = vmatmul.mubr.f32.gmra.mrb[10].mxu0 %v306_v34  ;;  %524 = vmatmul.mubr.f32.gmra.mrb[10].mxu1 %v314_v35 }
  0xd0   : > { %1557 = vmatpush1.bf16.msra.mxu1 %v1556_v36  ;;  %481 = vmatprep.mubr.f32.mxu0 %v2088_v8 }
  0xd1   : > { %529 = vmatprep.mubr.f32.mxu1 %v2088_v8  ;;  %1559 = vmatprep.subr.bf16.mxu1 %v1558_v37 }
  0xd3   : > { %482 = vmatmul.mubr.f32.gmra.mrb[12].mxu0 %v307_v42  ;;  %530 = vmatmul.mubr.f32.gmra.mrb[12].mxu1 %v315_v43 }
  0xd4   : > { %1561 = vmatpush1.bf16.msra.mxu1 %v1560_v44  ;;  %487 = vmatprep.mubr.f32.mxu0 %v2088_v8 }
  0xd5   : > { %535 = vmatprep.mubr.f32.mxu1 %v2088_v8  ;;  %1563 = vmatprep.subr.bf16.mxu1 %v1562_v45 }
  0xd7   : > { %488 = vmatmul.mubr.f32.gmra.mrb[14].mxu0 %v308_v48  ;;  %536 = vmatmul.mubr.f32.gmra.mrb[14].mxu1 %v316_v49 }
  0xd8   : > { %1565 = vmatpush1.bf16.msra.mxu1 %v1564_v50  ;;  %606 = vmatprep.mubr.f32.mxu1 %v2088_v8 }
  0xdb   : > { %607 = vmatmul.mubr.f32.vlgmr.msra.gmra.mrb[16].mxu1 %v2443_v57  ;;  %v993_v57 = vld [vmem:[%s2397_s29 + $0x90] sm:$0xff] }
  0xdc   : > { %612 = vmatprep.mubr.f32.mxu1 %v2088_v8 }
  0xdf   : > { %613 = vmatmul.mubr.f32.gmra.mrb[18].mxu1 %v2456_v1  ;;  %v979_v1 = vld [vmem:[%s2397_s29 + $0x20] sm:$0xff] }
  0xe0   : > { %618 = vmatprep.mubr.f32.mxu1 %v2088_v8 }
  0xe3   : > { %619 = vmatmul.mubr.f32.gmra.mrb[20].mxu1 %v2470_v10  ;;  %v1580_v10 = vpack.c.bf16 %v982_v9, %v981_v7 }
  0xe4   : > { %624 = vmatprep.mubr.f32.mxu1 %v2088_v8 }
  0xe7   : > { %625 = vmatmul.mubr.f32.gmra.mrb[22].mxu1 %v2484_v18  ;;  %v1002_v18 = vld [vmem:[%s2397_s29 + $0xd8] sm:$0xff] }
  0xe8   : > { %630 = vmatprep.mubr.f32.mxu1 %v2088_v8 }
  0xeb   : > { %631 = vmatmul.mubr.f32.gmra.mrb[24].mxu1 %v305_v26  ;;  %v987_v26 = vld [vmem:[%s2397_s29 + $0x60] sm:$0xff] }
  0xec   : > { %636 = vmatprep.mubr.f32.mxu1 %v2088_v8 }
  0xef   : > { %637 = vmatmul.mubr.f32.gmra.mrb[26].mxu1 %v306_v34  ;;  %v1596_v34 = vpack.c.bf16 %v990_v33, %v989_v32 }
  0xf0   : > { %642 = vmatprep.mubr.f32.mxu1 %v2088_v8 }
  0xf3   : > { %643 = vmatmul.mubr.f32.gmra.mrb[28].mxu1 %v307_v42 }
  0xf4   : > { %648 = vmatprep.mubr.f32.mxu1 %v2088_v8 }
  0xf7   : > { %649 = vmatmul.mubr.f32.gmra.mrb[30].mxu1 %v308_v48 }
  0xf8   : > { %654 = vmatprep.mubr.f32.mxu1 %v2088_v8 }
  0xfb   : > { %655 = vmatmul.mubr.f32.gmra.mrb[32].mxu1 %v2446_v58  ;;  %v994_v58 = vld [vmem:[%s2397_s29 + $0x98] sm:$0xff] }
  0xfc   : > { %660 = vmatprep.mubr.f32.mxu1 %v2088_v8  ;;  %v1570_v59 = vpack.c.bf16 %v994_v58, %v993_v57 }
  0xfe   : > { %1571 = vmatprep.subr.bf16.mxu0 %v1570_v59 }
  0xff   : > { %661 = vmatmul.mubr.f32.gmra.mrb[34].mxu1 %v2459_v2  ;;  %1573 = vmatpush3.bf16.msra.mxu0 %v1572_v62  ;;  %v980_v2 = vld [vmem:[%s2397_s29 + $0x28] sm:$0xff] }
 0x100   : > { %666 = vmatprep.mubr.f32.mxu1 %v2088_v8  ;;  %v1576_v3 = vpack.c.bf16 %v980_v2, %v979_v1 }
 0x103   : > { %667 = vmatmul.mubr.f32.gmra.mrb[36].mxu1 %v2473_v11  ;;  %v999_v11 = vld [vmem:[%s2397_s29 + $0xc0] sm:$0xff] }
 0x104   : > { %672 = vmatprep.mubr.f32.mxu1 %v2088_v8  ;;  %v1582_v13 = vpack.c.bf16 %v1000_v12, %v999_v11 }
 0x107   : > { %673 = vmatmul.mubr.f32.gmra.mrb[38].mxu1 %v2487_v19  ;;  %v1586_v19 = vpack.c.bf16 %v1002_v18, %v1001_v17 }
 0x108   : > { %678 = vmatprep.mubr.f32.mxu1 %v2088_v8 }
 0x10b   : > { %679 = vmatmul.mubr.f32.gmra.mrb[40].mxu1 %v2499_v27  ;;  %v988_v27 = vld [vmem:[%s2397_s29 + $0x68] sm:$0xff] }
 0x10c   : > { %684 = vmatprep.mubr.f32.mxu1 %v2088_v8  ;;  %v1592_v28 = vpack.c.bf16 %v988_v27, %v987_v26 }
 0x10f   : > { %685 = vmatmul.mubr.f32.gmra.mrb[42].mxu1 %v314_v35 }
 0x110   : > { %690 = vmatprep.mubr.f32.mxu1 %v2088_v8 }
 0x113   : > { %691 = vmatmul.mubr.f32.gmra.mrb[44].mxu1 %v315_v43 }
 0x114   : > { %696 = vmatprep.mubr.f32.mxu1 %v2088_v8  ;;  %v996_v8 = vld [vmem:[%s2397_s29 + $0xa8] sm:$0xff] }
 0x115   : > { %v1574_v0 = vpack.c.bf16 %v996_v8, %v995_v63 }
 0x117   : > { %697 = vmatmul.mubr.f32.gmra.mrb[46].mxu1 %v316_v49  ;;  %1575 = vmatprep.subr.bf16.mxu0 %v1574_v0 }
 0x118   : > { %1577 = vmatpush3.bf16.msra.mxu0 %v1576_v3 }
 0x119   : > { %1579 = vmatprep.subr.bf16.mxu0 %v1578_v6 }
 0x11c   : > { %1581 = vmatpush3.bf16.msra.mxu0 %v1580_v10 }
 0x11d   : > { %1583 = vmatprep.subr.bf16.mxu0 %v1582_v13 }
 0x120   : > { %1585 = vmatpush3.bf16.msra.mxu0 %v1584_v16 }
 0x121   : > { %1587 = vmatprep.subr.bf16.mxu0 %v1586_v19 }
 0x124   : > { %1589 = vmatpush3.bf16.msra.mxu0 %v1588_v22 }
 0x125   : > { %1591 = vmatprep.subr.bf16.mxu0 %v1590_v25 }
 0x128   : > { %1593 = vmatpush3.bf16.msra.mxu0 %v1592_v28 }
 0x129   : > { %1595 = vmatprep.subr.bf16.mxu0 %v1594_v31 }
 0x12c   : > { %1597 = vmatpush3.bf16.msra.mxu0 %v1596_v34 }
 0x18e   : > { %v2582_v35 = vpop.f32.mrb[0].mxu0  ;;  %v2584_v36 = vpop.f32.mrb[0].mxu1 }
 0x18f   : > { %v1380_v37 = vmul.f32 -1.442695, %v2582_v35  ;;  %v2587_v38 = vpop.f32.mrb[1].mxu0  ;;  %v2589_v39 = vpop.f32.mrb[1].mxu1  ;;  %v1396_v53 = vmul.f32 -1.442695, %v2584_v36 }
 0x190   : > { %v1381_v40 = vmul.f32 -1.442695, %v2587_v38  ;;  %v1397_v57 = vmul.f32 -1.442695, %v2589_v39 }
 0x191   : > { %1734 = vpow2.f32 %v1380_v37 }
 0x192   : > { %v2592_v41 = vpop.f32.mrb[2].mxu0  ;;  %v2594_v42 = vpop.f32.mrb[2].mxu1  ;;  %1736 = vpow2.f32 %v1381_v40 }
 0x193   : > { %v1382_v43 = vmul.f32 -1.442695, %v2592_v41  ;;  %v2597_v44 = vpop.f32.mrb[3].mxu0  ;;  %v2599_v45 = vpop.f32.mrb[3].mxu1  ;;  %v1398_v8 = vmul.f32 -1.442695, %v2594_v42 }
 0x194   : > { %v1383_v46 = vmul.f32 -1.442695, %v2597_v44  ;;  %v1399_v3 = vmul.f32 -1.442695, %v2599_v45 }
 0x195   : > { %1738 = vpow2.f32 %v1382_v43 }
 0x196   : > { %v2602_v47 = vpop.f32.mrb[4].mxu0  ;;  %v2604_v48 = vpop.f32.mrb[4].mxu1  ;;  %1740 = vpow2.f32 %v1383_v46 }
 0x197   : > { %v1384_v49 = vmul.f32 -1.442695, %v2602_v47  ;;  %v2607_v50 = vpop.f32.mrb[5].mxu0  ;;  %v2609_v51 = vpop.f32.mrb[5].mxu1  ;;  %v1400_v10 = vmul.f32 -1.442695, %v2604_v48 }
 0x198   : > { %v1385_v52 = vmul.f32 -1.442695, %v2607_v50  ;;  %v1401_v14 = vmul.f32 -1.442695, %v2609_v51 }
 0x199   : > { %1742 = vpow2.f32 %v1384_v49 }
 0x19a   : > { %v2613_v54 = vpop.f32.mrb[6].mxu0  ;;  %v2615_v55 = vpop.f32.mrb[6].mxu1  ;;  %1744 = vpow2.f32 %v1385_v52 }
 0x19b   : > { %v1735_v56 = vpop.eup %1734  ;;  %v1386_v58 = vmul.f32 -1.442695, %v2613_v54  ;;  %v2619_v59 = vpop.f32.mrb[7].mxu0 }
 0x19c   : > { %v2621_v60 = vpop.f32.mrb[7].mxu1  ;;  %v799_v61 = vadd.f32 1.0, %v1735_v56  ;;  %v1737_v62 = vpop.eup %1736  ;;  %v1387_v26 = vmul.f32 -1.442695, %v2619_v59 }
 0x19d   : > { %1746 = vpow2.f32 %v1386_v58  ;;  %v800_v63 = vadd.f32 1.0, %v1737_v62 }
 0x19e   : > { %1748 = vpow2.f32 %v1396_v53  ;;  %v2624_v0 = vpop.f32.mrb[8].mxu0  ;;  %v2626_v1 = vpop.f32.mrb[8].mxu1 }
 0x19f   : > { %v1739_v2 = vpop.eup %1738  ;;  %1750 = vpow2.f32 %v1397_v57  ;;  %v2629_v4 = vpop.f32.mrb[9].mxu0  ;;  %v1388_v30 = vmul.f32 -1.442695, %v2624_v0 }
 0x1a0   : > { %1752 = vrcp.f32 %v799_v61  ;;  %v801_v5 = vadd.f32 1.0, %v1739_v2  ;;  %v2631_v6 = vpop.f32.mrb[9].mxu1  ;;  %v1741_v7 = vpop.eup %1740  ;;  %v1389_v46 = vmul.f32 -1.442695, %v2629_v4 }
 0x1a1   : > { %1754 = vrcp.f32 %v800_v63  ;;  %v802_v9 = vadd.f32 1.0, %v1741_v7 }
 0x1a2   : > { %1756 = vpow2.f32 %v1398_v8  ;;  %v2634_v11 = vpop.f32.mrb[10].mxu0  ;;  %v2636_v12 = vpop.f32.mrb[10].mxu1 }
 0x1a3   : > { %v1743_v13 = vpop.eup %1742  ;;  %1758 = vpow2.f32 %v1399_v3  ;;  %v2639_v15 = vpop.f32.mrb[11].mxu0  ;;  %v1390_v58 = vmul.f32 -1.442695, %v2634_v11 }
 0x1a4   : > { %1760 = vrcp.f32 %v801_v5  ;;  %v803_v16 = vadd.f32 1.0, %v1743_v13  ;;  %v2641_v17 = vpop.f32.mrb[11].mxu1  ;;  %v1745_v18 = vpop.eup %1744  ;;  %v1391_v5 = vmul.f32 -1.442695, %v2639_v15 }
 0x1a5   : > { %1762 = vrcp.f32 %v802_v9  ;;  %v804_v19 = vadd.f32 1.0, %v1745_v18 }
 0x1a6   : > { %1764 = vpow2.f32 %v1400_v10  ;;  %v2643_v20 = vpop.f32.mrb[12].mxu0  ;;  %v2645_v21 = vpop.f32.mrb[12].mxu1 }
 0x1a7   : > { %v1747_v22 = vpop.eup %1746  ;;  %1766 = vpow2.f32 %v1401_v14  ;;  %v2647_v23 = vpop.f32.mrb[13].mxu0  ;;  %v1392_v14 = vmul.f32 -1.442695, %v2643_v20 }
 0x1a8   : > { %v1749_v24 = vpop.eup %1748  ;;  %1768 = vrcp.f32 %v803_v16  ;;  %v805_v25 = vadd.f32 1.0, %v1747_v22  ;;  %v2650_v27 = vpop.f32.mrb[13].mxu1 }
 0x1a9   : > { %v1751_v28 = vpop.eup %1750  ;;  %1770 = vrcp.f32 %v804_v19  ;;  %v815_v34 = vadd.f32 1.0, %v1749_v24 }
 0x1aa   : > { %v1753_v29 = vpop.eup %1752  ;;  %v2653_v31 = vpop.f32.mrb[14].mxu0  ;;  %1772 = vrcp.f32 %v805_v25  ;;  %v816_v53 = vadd.f32 1.0, %v1751_v28  ;;  %v1402_v25 = vmul.f32 -1.442695, %v2615_v55 }
 0x1ab   : > { %v2655_v32 = vpop.f32.mrb[14].mxu1  ;;  %v1755_v33 = vpop.eup %1754  ;;  %1774 = vpow2.f32 %v1387_v26  ;;  %v895_v52 = vmul.f32 %v1753_v29, %v2582_v35 }
 0x1ac   : > { %v2657_v37 = vpop.f32.mrb[15].mxu0  ;;  %v2659_v40 = vpop.f32.mrb[15].mxu1  ;;  %v896_v57 = vmul.f32 %v1755_v33, %v2587_v38  ;;  %1776 = vpow2.f32 %v1388_v30 }
 0x1ad   : > { %v1757_v43 = vpop.eup %1756  ;;  %1778 = vrcp.f32 %v815_v34 }
 0x1ae   : > { %v1759_v49 = vpop.eup %1758  ;;  %v608_v61 = vpop.f32.mrb[16].mxu1  ;;  %v817_v63 = vadd.f32 1.0, %v1757_v43  ;;  %1780 = vpow2.f32 %v1389_v46 }
 0x1af   : > { %v1761_v56 = vpop.eup %1760  ;;  %v927_v8 = vmul.f32 %v895_v52, %v608_v61  ;;  %v610_v2 = vpop.f32.mrb[17].mxu1  ;;  %1782 = vrcp.f32 %v816_v53  ;;  %v818_v10 = vadd.f32 1.0, %v1759_v49  ;;  %v1403_v52 = vmul.f32 -1.442695, %v2621_v60 }
 0x1b0   : > { %v1763_v62 = vpop.eup %1762  ;;  %v928_v7 = vmul.f32 %v896_v57, %v610_v2  ;;  %v897_v35 = vmul.f32 %v1761_v56, %v2592_v41  ;;  %1784 = vpow2.f32 %v1390_v58  ;;  %v1404_v58 = vmul.f32 -1.442695, %v2626_v1 }
 0x1b1   : > { %v1765_v3 = vpop.eup %1764  ;;  %v898_v13 = vmul.f32 %v1763_v62, %v2597_v44  ;;  %1786 = vrcp.f32 %v817_v63 }
 0x1b2   : > { %v1767_v9 = vpop.eup %1766  ;;  %v614_v16 = vpop.f32.mrb[18].mxu1  ;;  %1071 = vmatprep.mubr.f32.mxu0 %v928_v7  ;;  %v819_v19 = vadd.f32 1.0, %v1765_v3  ;;  %1788 = vpow2.f32 %v1391_v5  ;;  %v1405_v5 = vmul.f32 -1.442695, %v2631_v6 }
 0x1b3   : > { %v1769_v38 = vpop.eup %1768  ;;  %v929_v22 = vmul.f32 %v897_v35, %v614_v16  ;;  %v616_v24 = vpop.f32.mrb[19].mxu1  ;;  %1072 = vmatmul.mubr.f32.vlgmr.msra.gmra.mrb[16].mxu0 %v927_v8  ;;  %1790 = vrcp.f32 %v818_v10  ;;  %v820_v30 = vadd.f32 1.0, %v1767_v9  ;;  %v1406_v35 = vmul.f32 -1.442695, %v2636_v12 }
 0x1b4   : > { %v1771_v18 = vpop.eup %1770  ;;  %v930_v26 = vmul.f32 %v898_v13, %v616_v24  ;;  %v899_v28 = vmul.f32 %v1769_v38, %v2602_v47  ;;  %1792 = vpow2.f32 %v1392_v14  ;;  %v1393_v24 = vmul.f32 -1.442695, %v2647_v23 }
 0x1b5   : > { %v1773_v41 = vpop.eup %1772  ;;  %v900_v29 = vmul.f32 %v1771_v18, %v2607_v50  ;;  %1794 = vrcp.f32 %v819_v19  ;;  %v1407_v18 = vmul.f32 -1.442695, %v2641_v17 }
 0x1b6   : > { %v1775_v44 = vpop.eup %1774  ;;  %v620_v33 = vpop.f32.mrb[20].mxu1  ;;  %1076 = vmatprep.mubr.f32.mxu0 %v930_v26  ;;  %1796 = vpow2.f32 %v1402_v25  ;;  %v901_v47 = vmul.f32 %v1773_v41, %v2613_v54  ;;  %v1408_v26 = vmul.f32 -1.442695, %v2645_v21 }
 0x1b7   : > { %v806_v34 = vadd.f32 1.0, %v1775_v44  ;;  %v931_v43 = vmul.f32 %v899_v28, %v620_v33  ;;  %v622_v46 = vpop.f32.mrb[21].mxu1  ;;  %1077 = vmatmul.mubr.f32.gmra.mrb[18].mxu0 %v929_v22  ;;  %v1777_v49 = vpop.eup %1776  ;;  %v1394_v44 = vmul.f32 -1.442695, %v2653_v31 }
 0x1b8   : > { %v932_v53 = vmul.f32 %v900_v29, %v622_v46  ;;  %v2673_v56 = vpop.eup %1778  ;;  %v807_v50 = vadd.f32 1.0, %v1777_v49  ;;  %v1395_v46 = vmul.f32 -1.442695, %v2657_v37 }
 0x1b9   : > { %1798 = vrcp.f32 %v806_v34  ;;  %v1781_v57 = vpop.eup %1780  ;;  %v1409_v34 = vmul.f32 -1.442695, %v2650_v27 }
 0x1ba   : > { %1800 = vrcp.f32 %v820_v30  ;;  %v626_v61 = vpop.f32.mrb[22].mxu1  ;;  %1081 = vmatprep.mubr.f32.mxu0 %v932_v53  ;;  %v2677_v62 = vpop.eup %1782  ;;  %v808_v63 = vadd.f32 1.0, %v1781_v57 }
 0x1bb   : > { %1802 = vrcp.f32 %v807_v50  ;;  %v933_v8 = vmul.f32 %v901_v47, %v626_v61  ;;  %v628_v2 = vpop.f32.mrb[23].mxu1  ;;  %1082 = vmatmul.mubr.f32.gmra.mrb[20].mxu0 %v931_v43  ;;  %v1785_v3 = vpop.eup %1784 }
 0x1bc   : > { %1804 = vpow2.f32 %v1403_v52  ;;  %v2680_v54 = vpop.eup %1786  ;;  %v809_v7 = vadd.f32 1.0, %v1785_v3  ;;  %v1411_v3 = vmul.f32 -1.442695, %v2659_v40 }
 0x1bd   : > { %1806 = vrcp.f32 %v808_v63  ;;  %v1789_v9 = vpop.eup %1788 }
 0x1be   : > { %1808 = vpow2.f32 %v1404_v58  ;;  %v632_v10 = vpop.f32.mrb[24].mxu1  ;;  %v2683_v38 = vpop.eup %1790  ;;  %v810_v13 = vadd.f32 1.0, %v1789_v9  ;;  %v1410_v58 = vmul.f32 -1.442695, %v2655_v32 }
 0x1bf   : > { %1810 = vrcp.f32 %v809_v7  ;;  %v634_v14 = vpop.f32.mrb[25].mxu1  ;;  %v1793_v16 = vpop.eup %1792 }
 0x1c0   : > { %1812 = vpow2.f32 %v1405_v5  ;;  %v2686_v19 = vpop.eup %1794  ;;  %v811_v22 = vadd.f32 1.0, %v1793_v16 }
 0x1c1   : > { %1814 = vrcp.f32 %v810_v13  ;;  %v1797_v25 = vpop.eup %1796 }
 0x1c2   : > { %1816 = vpow2.f32 %v1406_v35  ;;  %v638_v41 = vpop.f32.mrb[26].mxu1  ;;  %v821_v52 = vadd.f32 1.0, %v1797_v25 }
 0x1c3   : > { %v1799_v28 = vpop.eup %1798  ;;  %1818 = vrcp.f32 %v811_v22  ;;  %v640_v29 = vpop.f32.mrb[27].mxu1 }
 0x1c4   : > { %v2691_v30 = vpop.eup %1800  ;;  %v902_v33 = vmul.f32 %v1799_v28, %v2619_v59  ;;  %1820 = vpow2.f32 %v1407_v18 }
 0x1c5   : > { %v1803_v43 = vpop.eup %1802  ;;  %1822 = vpow2.f32 %v1393_v24 }
 0x1c6   : > { %v1805_v49 = vpop.eup %1804  ;;  %v903_v53 = vmul.f32 %v1803_v43, %v2624_v0  ;;  %1824 = vpow2.f32 %v1408_v26  ;;  %v934_v47 = vmul.f32 %v902_v33, %v628_v2  ;;  %v644_v50 = vpop.f32.mrb[28].mxu1  ;;  %v912_v26 = vmul.f32 %v2677_v62, %v2589_v39 }
 0x1c7   : > { %v1807_v57 = vpop.eup %1806  ;;  %1826 = vpow2.f32 %v1394_v44  ;;  %v2698_v61 = vpop.f32.mrb[29].mxu1  ;;  %v822_v9 = vadd.f32 1.0, %v1805_v49  ;;  %v913_v39 = vmul.f32 %v2680_v54, %v2594_v42 }
 0x1c8   : > { %v1809_v59 = vpop.eup %1808  ;;  %v904_v63 = vmul.f32 %v1807_v57, %v2629_v4  ;;  %1828 = vpow2.f32 %v1409_v34  ;;  %v935_v5 = vmul.f32 %v903_v53, %v632_v10  ;;  %1086 = vmatprep.mubr.f32.mxu0 %v934_v47 }
 0x1c9   : > { %v1811_v7 = vpop.eup %1810  ;;  %1830 = vpow2.f32 %v1395_v46  ;;  %1087 = vmatmul.mubr.f32.gmra.mrb[22].mxu0 %v933_v8  ;;  %v823_v22 = vadd.f32 1.0, %v1809_v59  ;;  %v911_v8 = vmul.f32 %v2673_v56, %v2584_v36 }
 0x1ca   : > { %v1813_v0 = vpop.eup %1812  ;;  %1832 = vrcp.f32 %v821_v52  ;;  %v905_v2 = vmul.f32 %v1811_v7, %v2634_v11  ;;  %v936_v35 = vmul.f32 %v904_v63, %v634_v14  ;;  %v2703_v13 = vpop.f32.mrb[30].mxu1  ;;  %v916_v7 = vmul.f32 %v2691_v30, %v2609_v51 }
 0x1cb   : > { %v1815_v16 = vpop.eup %1814  ;;  %1834 = vpow2.f32 %v1410_v58  ;;  %v2705_v18 = vpop.f32.mrb[31].mxu1  ;;  %v824_v11 = vadd.f32 1.0, %v1813_v0 }
 0x1cc   : > { %v1817_v4 = vpop.eup %1816  ;;  %v906_v10 = vmul.f32 %v1815_v16, %v2639_v15  ;;  %1836 = vpow2.f32 %v1411_v3  ;;  %v937_v24 = vmul.f32 %v905_v2, %v638_v41  ;;  %1091 = vmatprep.mubr.f32.mxu0 %v936_v35 }
 0x1cd   : > { %v1819_v25 = vpop.eup %1818  ;;  %1838 = vrcp.f32 %v822_v9  ;;  %1092 = vmatmul.mubr.f32.gmra.mrb[24].mxu0 %v935_v5  ;;  %v825_v15 = vadd.f32 1.0, %v1817_v4  ;;  %v915_v5 = vmul.f32 %v2686_v19, %v2604_v48 }
 0x1ce   : > { %v1821_v14 = vpop.eup %1820  ;;  %v907_v28 = vmul.f32 %v1819_v25, %v2643_v20  ;;  %v938_v44 = vmul.f32 %v906_v10, %v640_v29  ;;  %v656_v33 = vpop.f32.mrb[32].mxu1  ;;  %1840 = vrcp.f32 %v823_v22  ;;  %v914_v29 = vmul.f32 %v2683_v38, %v2599_v45 }
 0x1cf   : > { %v1823_v34 = vpop.eup %1822  ;;  %v2713_v43 = vmul.f32 %v911_v8, %v656_v33  ;;  %v658_v41 = vpop.f32.mrb[33].mxu1  ;;  %1842 = vrcp.f32 %v824_v11  ;;  %v826_v20 = vadd.f32 1.0, %v1821_v14 }
 0x1d0   : > { %v1825_v46 = vpop.eup %1824  ;;  %v812_v49 = vadd.f32 1.0, %v1823_v34  ;;  %v2715_v36 = vmul.f32 %v907_v28, %v644_v50  ;;  %1096 = vmatprep.mubr.f32.mxu0 %v938_v44  ;;  %v2717_v56 = vmul.f32 %v912_v26, %v658_v41 }
 0x1d1   : > { %v1827_v52 = vpop.eup %1826  ;;  %1097 = vmatmul.mubr.f32.gmra.mrb[26].mxu0 %v937_v24  ;;  %v827_v63 = vadd.f32 1.0, %v1825_v46 }
 0x1d2   : > { %v1829_v62 = vpop.eup %1828  ;;  %1844 = vrcp.f32 %v812_v49  ;;  %v813_v53 = vadd.f32 1.0, %v1827_v52  ;;  %v662_v47 = vpop.f32.mrb[34].mxu1 }
 0x1d3   : > { %v1831_v57 = vpop.eup %1830  ;;  %1846 = vrcp.f32 %v825_v15  ;;  %v2723_v50 = vmul.f32 %v913_v39, %v662_v47  ;;  %v664_v58 = vpop.f32.mrb[35].mxu1  ;;  %v828_v45 = vadd.f32 1.0, %v1829_v62 }
 0x1d4   : > { %v1833_v59 = vpop.eup %1832  ;;  %1848 = vrcp.f32 %v813_v53  ;;  %v814_v3 = vadd.f32 1.0, %v1831_v57  ;;  %v2725_v42 = vmul.f32 %v914_v29, %v664_v58 }
 0x1d5   : > { %v1835_v54 = vpop.eup %1834  ;;  %1850 = vrcp.f32 %v826_v20  ;;  %v917_v22 = vmul.f32 %v1833_v59, %v2615_v55 }
 0x1d6   : > { %v1837_v38 = vpop.eup %1836  ;;  %1852 = vrcp.f32 %v814_v3  ;;  %v668_v9 = vpop.f32.mrb[36].mxu1  ;;  %v829_v16 = vadd.f32 1.0, %v1835_v54 }
 0x1d7   : > { %v1839_v0 = vpop.eup %1838  ;;  %v2731_v2 = vmul.f32 %v915_v5, %v668_v9  ;;  %v670_v35 = vpop.f32.mrb[37].mxu1  ;;  %1854 = vrcp.f32 %v827_v63  ;;  %v830_v10 = vadd.f32 1.0, %v1837_v38 }
 0x1d8   : > { %v948_v4 = vmul.f32 %v916_v7, %v670_v35  ;;  %1856 = vrcp.f32 %v828_v45  ;;  %v1841_v48 = vpop.eup %1840  ;;  %v918_v19 = vmul.f32 %v1839_v0, %v2621_v60  ;;  %v961_v0 = vld [vmem:[#allocation2 + $0x10] sm:$0xff] }
 0x1d9   : > { %v1843_v25 = vpop.eup %1842  ;;  %1858 = vrcp.f32 %v829_v16  ;;  %v919_v26 = vmul.f32 %v1841_v48, %v2626_v1 }
 0x1da   : > { %v674_v24 = vpop.f32.mrb[38].mxu1  ;;  %1860 = vrcp.f32 %v830_v10  ;;  %v920_v55 = vmul.f32 %v1843_v25, %v2631_v6  ;;  %v963_v25 = vld [vmem:[#allocation2 + $0x20] sm:$0xff] }
 0x1db   : > { %v949_v8 = vmul.f32 %v917_v22, %v674_v24  ;;  %v676_v51 = vpop.f32.mrb[39].mxu1  ;;  %v962_v22 = vld [vmem:[#allocation2 + $0x18] sm:$0xff] }
 0x1dc   : > { %v1845_v30 = vpop.eup %1844  ;;  %v950_v11 = vmul.f32 %v918_v19, %v676_v51 }
 0x1dd   : > { %v1847_v14 = vpop.eup %1846  ;;  %v908_v28 = vmul.f32 %v1845_v30, %v2647_v23 }
 0x1de   : > { %v1849_v44 = vpop.eup %1848  ;;  %v680_v33 = vpop.f32.mrb[40].mxu1  ;;  %v921_v39 = vmul.f32 %v1847_v14, %v2636_v12  ;;  %v964_v14 = vld [vmem:[#allocation2 + $0x28] sm:$0xff] }
 0x1df   : > { %v1851_v34 = vpop.eup %1850  ;;  %v909_v60 = vmul.f32 %v1849_v44, %v2653_v31  ;;  %v940_v15 = vmul.f32 %v908_v28, %v2698_v61  ;;  %v951_v41 = vmul.f32 %v919_v26, %v680_v33  ;;  %v682_v46 = vpop.f32.mrb[41].mxu1  ;;  %v965_v33 = vld [vmem:[#allocation2 + $0x30] sm:$0xff] }
 0x1e0   : > { %v1853_v49 = vpop.eup %1852  ;;  %v952_v52 = vmul.f32 %v920_v55, %v682_v46  ;;  %v922_v6 = vmul.f32 %v1851_v34, %v2641_v17  ;;  %v966_v46 = vld [vmem:[#allocation2 + $0x38] sm:$0xff] }
 0x1e1   : > { %v910_v1 = vmul.f32 %v1853_v49, %v2657_v37  ;;  %v941_v23 = vmul.f32 %v909_v60, %v2703_v13  ;;  %1101 = vmatprep.mubr.f32.mxu0 %v940_v15  ;;  %v1855_v20 = vpop.eup %1854 }
 0x1e2   : > { %1102 = vmatmul.mubr.f32.gmra.mrb[28].mxu0 %v2715_v36  ;;  %v686_v62 = vpop.f32.mrb[42].mxu1  ;;  %v1857_v31 = vpop.eup %1856  ;;  %v923_v57 = vmul.f32 %v1855_v20, %v2645_v21 }
 0x1e3   : > { %v942_v61 = vmul.f32 %v910_v1, %v2705_v18  ;;  %v953_v29 = vmul.f32 %v921_v39, %v686_v62  ;;  %v688_v53 = vpop.f32.mrb[43].mxu1  ;;  %v1859_v12 = vpop.eup %1858  ;;  %v924_v37 = vmul.f32 %v1857_v31, %v2650_v27 }
 0x1e4   : > { %v954_v47 = vmul.f32 %v922_v6, %v688_v53  ;;  %v1861_v58 = vpop.eup %1860  ;;  %v925_v63 = vmul.f32 %v1859_v12, %v2655_v32  ;;  %v969_v12 = vld [vmem:[#allocation2 + $0x50] sm:$0xff] }
 0x1e5   : > { %1106 = vmatprep.mubr.f32.mxu0 %v942_v61  ;;  %v926_v18 = vmul.f32 %v1861_v58, %v2659_v40  ;;  %v959_v40 = vld [vmem:[#allocation2] sm:$0xff]  ;;  %v968_v61 = vld [vmem:[#allocation2 + $0x48] sm:$0xff] }
 0x1e6   : > { %1107 = vmatmul.mubr.f32.gmra.mrb[30].mxu0 %v941_v23  ;;  %v692_v13 = vpop.f32.mrb[44].mxu1  ;;  %v967_v23 = vld [vmem:[#allocation2 + $0x40] sm:$0xff] }
 0x1e7   : > { %1111 = vmatprep.mubr.f32.mxu0 %v2717_v56  ;;  %v955_v17 = vmul.f32 %v923_v57, %v692_v13  ;;  %v694_v36 = vpop.f32.mrb[45].mxu1 }
 0x1e8   : > { %v956_v59 = vmul.f32 %v924_v37, %v694_v36  ;;  %v970_v36 = vld [vmem:[#allocation2 + $0x58] sm:$0xff] }
 0x1ea   : > { %1112 = vmatmul.mubr.f32.gmra.mrb[32].mxu0 %v2713_v43  ;;  %v698_v3 = vpop.f32.mrb[46].mxu1 }
 0x1eb   : > { %1116 = vmatprep.mubr.f32.mxu0 %v2725_v42  ;;  %v957_v21 = vmul.f32 %v925_v63, %v698_v3  ;;  %v700_v54 = vpop.f32.mrb[47].mxu1 }
 0x1ec   : > { %v958_v27 = vmul.f32 %v926_v18, %v700_v54 }
 0x1ee   : > { %1117 = vmatmul.mubr.f32.gmra.mrb[34].mxu0 %v2723_v50  ;;  %v960_v50 = vld [vmem:[#allocation2 + $0x8] sm:$0xff] }
 0x1ef   : > { %1121 = vmatprep.mubr.f32.mxu0 %v948_v4 }
 0x1f2   : > { %1122 = vmatmul.mubr.f32.gmra.mrb[36].mxu0 %v2731_v2 }
 0x1f3   : > { %1126 = vmatprep.mubr.f32.mxu0 %v950_v11 }
 0x1f6   : > { %1127 = vmatmul.mubr.f32.gmra.mrb[38].mxu0 %v949_v8 }
 0x1f7   : > { %1131 = vmatprep.mubr.f32.mxu0 %v952_v52 }
 0x1fa   : > { %1132 = vmatmul.mubr.f32.gmra.mrb[40].mxu0 %v951_v41 }
 0x1fb   : > { %1136 = vmatprep.mubr.f32.mxu0 %v954_v47 }
 0x1fe   : > { %1137 = vmatmul.mubr.f32.gmra.mrb[42].mxu0 %v953_v29 }
 0x1ff   : > { %1141 = vmatprep.mubr.f32.mxu0 %v956_v59 }
 0x202   : > { %1142 = vmatmul.mubr.f32.gmra.mrb[44].mxu0 %v955_v17 }
 0x203   : > { %1146 = vmatprep.mubr.f32.mxu0 %v958_v27 }
 0x206   : > { %1147 = vmatmul.mubr.f32.gmra.mrb[46].mxu0 %v957_v21  ;;  %v971_v21 = vld [vmem:[#allocation2 + $0x60] sm:$0xff] }
 0x286   : > { %v1454_v32 = vpop.f32.mrb[16].mxu0 }
 0x287   : > { %v1455_v43 = vpop.f32.mrb[17].mxu0 }
 0x288   : > { %v1456_v56 = vadd.f32 %v1455_v43, %v1454_v32  ;;  %v972_v43 = vld [vmem:[#allocation2 + $0x68] sm:$0xff] }
 0x28a   : > { %v1152_v42 = vadd.f32 %v1456_v56, %v959_v40  ;;  %v1457_v5 = vpop.f32.mrb[18].mxu0 }
 0x28b   : > { %v1458_v45 = vpop.f32.mrb[19].mxu0 }
 0x28c   : > { %1168 = vst [vmem:[#allocation2] sm:$0xff] %v1152_v42  ;;  %v1459_v38 = vadd.f32 %v1458_v45, %v1457_v5  ;;  %v973_v45 = vld [vmem:[#allocation2 + $0x70] sm:$0xff] }
 0x28e   : > { %v1153_v7 = vadd.f32 %v1459_v38, %v960_v50  ;;  %v1460_v9 = vpop.f32.mrb[20].mxu0 }
 0x28f   : > { %v1461_v2 = vpop.f32.mrb[21].mxu0 }
 0x290   : > { %1169 = vst [vmem:[#allocation2 + $0x8] sm:$0xff] %v1153_v7  ;;  %v1462_v35 = vadd.f32 %v1461_v2, %v1460_v9  ;;  %v974_v2 = vld [vmem:[#allocation2 + $0x78] sm:$0xff] }
 0x292   : > { %v1154_v16 = vadd.f32 %v1462_v35, %v961_v0 }
 0x294   : > { %1170 = vst [vmem:[#allocation2 + $0x10] sm:$0xff] %v1154_v16 }
 0x29c   : > { %v1463_v4 = vpop.f32.mrb[22].mxu0 }
 0x29d   : > { %v1464_v10 = vpop.f32.mrb[23].mxu0 }
 0x29e   : > { %v1465_v48 = vadd.f32 %v1464_v10, %v1463_v4  ;;  %v1189_v10 = vld [vmem:[#allocation2 + $0x8] sm:$0xff] (!%p1412_p6) }
 0x29f   : > { %1205 = vst [vmem:[%s2399_s21 + $0x8] sm:$0xff] (!%p1412_p6), %v1189_v10 }
 0x2a0   : > { %v1155_v19 = vadd.f32 %v1465_v48, %v962_v22  ;;  %v1466_v24 = vpop.f32.mrb[24].mxu0  ;;  %v1188_v22 = vld [vmem:[#allocation2] sm:$0xff] (!%p1412_p6)  ;;  %v1190_v48 = vld [vmem:[#allocation2 + $0x10] sm:$0xff] (!%p1412_p6) }
 0x2a1   : > { %v1467_v8 = vpop.f32.mrb[25].mxu0  ;;  %1204 = vst [vmem:[%s2399_s21] sm:$0xff] (!%p1412_p6), %v1188_v22  ;;  %1206 = vst [vmem:[%s2399_s21 + $0x10] sm:$0xff] (!%p1412_p6), %v1190_v48 }
 0x2a2   : > { %1171 = vst [vmem:[#allocation2 + $0x18] sm:$0xff] %v1155_v19  ;;  %v1468_v51 = vadd.f32 %v1467_v8, %v1466_v24 }
 0x2a4   : > { %v1156_v30 = vadd.f32 %v1468_v51, %v963_v25  ;;  %v1469_v11 = vpop.f32.mrb[26].mxu0 }
 0x2a5   : > { %v1470_v26 = vpop.f32.mrb[27].mxu0 }
 0x2a6   : > { %1172 = vst [vmem:[#allocation2 + $0x20] sm:$0xff] %v1156_v30  ;;  %v1471_v28 = vadd.f32 %v1470_v26, %v1469_v11 }
 0x2a8   : > { %v1157_v44 = vadd.f32 %v1471_v28, %v964_v14 }
 0x2a9   : > { %v1191_v19 = vld [vmem:[#allocation2 + $0x18] sm:$0xff] (!%p1412_p6) }
 0x2aa   : > { %1173 = vst [vmem:[#allocation2 + $0x28] sm:$0xff] %v1157_v44  ;;  %1207 = vst [vmem:[%s2399_s21 + $0x18] sm:$0xff] (!%p1412_p6), %v1191_v19 }
 0x2ad   : > { %v1192_v24 = vld [vmem:[#allocation2 + $0x20] sm:$0xff] (!%p1412_p6) }
 0x2ae   : > { %1208 = vst [vmem:[%s2399_s21 + $0x20] sm:$0xff] (!%p1412_p6), %v1192_v24 }
 0x2b1   : > { %v1193_v25 = vld [vmem:[#allocation2 + $0x28] sm:$0xff] (!%p1412_p6) }
 0x2b2   : > { %1209 = vst [vmem:[%s2399_s21 + $0x28] sm:$0xff] (!%p1412_p6), %v1193_v25 }
 0x2b5   : > { %v1472_v55 = vpop.f32.mrb[28].mxu0 }
 0x2b6   : > { %v1473_v34 = vpop.f32.mrb[29].mxu0 }
 0x2b7   : > { %v1474_v60 = vadd.f32 %v1473_v34, %v1472_v55 }
 0x2b9   : > { %v1158_v15 = vadd.f32 %v1474_v60, %v965_v33  ;;  %v1475_v41 = vpop.f32.mrb[30].mxu0 }
 0x2ba   : > { %v1476_v49 = vpop.f32.mrb[31].mxu0 }
 0x2bb   : > { %1174 = vst [vmem:[#allocation2 + $0x30] sm:$0xff] %v1158_v15  ;;  %v1477_v52 = vadd.f32 %v1476_v49, %v1475_v41 }
 0x2bd   : > { %v1159_v39 = vadd.f32 %v1477_v52, %v966_v46  ;;  %v1478_v1 = vpop.f32.mrb[32].mxu0 }
 0x2be   : > { %v1479_v20 = vpop.f32.mrb[33].mxu0 }
 0x2bf   : > { %1175 = vst [vmem:[#allocation2 + $0x38] sm:$0xff] %v1159_v39  ;;  %v1480_v6 = vadd.f32 %v1479_v20, %v1478_v1 }
 0x2c1   : > { %v1160_v62 = vadd.f32 %v1480_v6, %v967_v23  ;;  %v1481_v31 = vpop.f32.mrb[34].mxu0 }
 0x2c2   : > { %v1482_v29 = vpop.f32.mrb[35].mxu0  ;;  %v1194_v8 = vld [vmem:[#allocation2 + $0x30] sm:$0xff] (!%p1412_p6) }
 0x2c3   : > { %1176 = vst [vmem:[#allocation2 + $0x40] sm:$0xff] %v1160_v62  ;;  %v1483_v53 = vadd.f32 %v1482_v29, %v1481_v31  ;;  %1210 = vst [vmem:[%s2399_s21 + $0x30] sm:$0xff] (!%p1412_p6), %v1194_v8 }
 0x2c5   : > { %v1161_v47 = vadd.f32 %v1483_v53, %v968_v61  ;;  %v1484_v57 = vpop.f32.mrb[36].mxu0 }
 0x2c6   : > { %v1485_v37 = vpop.f32.mrb[37].mxu0  ;;  %v1195_v51 = vld [vmem:[#allocation2 + $0x38] sm:$0xff] (!%p1412_p6) }
 0x2c7   : > { %1177 = vst [vmem:[#allocation2 + $0x48] sm:$0xff] %v1161_v47  ;;  %v1486_v13 = vadd.f32 %v1485_v37, %v1484_v57  ;;  %1211 = vst [vmem:[%s2399_s21 + $0x38] sm:$0xff] (!%p1412_p6), %v1195_v51 }
 0x2c9   : > { %v1162_v58 = vadd.f32 %v1486_v13, %v969_v12  ;;  %v1487_v17 = vpop.f32.mrb[38].mxu0 }
 0x2ca   : > { %v1488_v59 = vpop.f32.mrb[39].mxu0  ;;  %v1196_v30 = vld [vmem:[#allocation2 + $0x40] sm:$0xff] (!%p1412_p6) }
 0x2cb   : > { %1178 = vst [vmem:[#allocation2 + $0x50] sm:$0xff] %v1162_v58  ;;  %v1489_v63 = vadd.f32 %v1488_v59, %v1487_v17  ;;  %1212 = vst [vmem:[%s2399_s21 + $0x40] sm:$0xff] (!%p1412_p6), %v1196_v30 }
 0x2cd   : > { %v1163_v18 = vadd.f32 %v1489_v63, %v970_v36  ;;  %v1490_v3 = vpop.f32.mrb[40].mxu0 }
 0x2ce   : > { %v1491_v54 = vpop.f32.mrb[41].mxu0  ;;  %v1197_v11 = vld [vmem:[#allocation2 + $0x48] sm:$0xff] (!%p1412_p6) }
 0x2cf   : > { %1179 = vst [vmem:[#allocation2 + $0x58] sm:$0xff] %v1163_v18  ;;  %v1492_v27 = vadd.f32 %v1491_v54, %v1490_v3  ;;  %1213 = vst [vmem:[%s2399_s21 + $0x48] sm:$0xff] (!%p1412_p6), %v1197_v11 }
 0x2d1   : > { %v1164_v32 = vadd.f32 %v1492_v27, %v971_v21  ;;  %v1493_v40 = vpop.f32.mrb[42].mxu0 }
 0x2d2   : > { %v1494_v56 = vpop.f32.mrb[43].mxu0  ;;  %v1198_v14 = vld [vmem:[#allocation2 + $0x50] sm:$0xff] (!%p1412_p6) }
 0x2d3   : > { %1180 = vst [vmem:[#allocation2 + $0x60] sm:$0xff] %v1164_v32  ;;  %v1495_v42 = vadd.f32 %v1494_v56, %v1493_v40  ;;  %1214 = vst [vmem:[%s2399_s21 + $0x50] sm:$0xff] (!%p1412_p6), %v1198_v14 }
 0x2d5   : > { %v1165_v5 = vadd.f32 %v1495_v42, %v972_v43  ;;  %v1496_v50 = vpop.f32.mrb[44].mxu0 }
 0x2d6   : > { %v1497_v38 = vpop.f32.mrb[45].mxu0  ;;  %v1199_v26 = vld [vmem:[#allocation2 + $0x58] sm:$0xff] (!%p1412_p6) }
 0x2d7   : > { %1181 = vst [vmem:[#allocation2 + $0x68] sm:$0xff] %v1165_v5  ;;  %v1498_v7 = vadd.f32 %v1497_v38, %v1496_v50  ;;  %1215 = vst [vmem:[%s2399_s21 + $0x58] sm:$0xff] (!%p1412_p6), %v1199_v26 }
 0x2d9   : > { %v1166_v9 = vadd.f32 %v1498_v7, %v973_v45  ;;  %v1499_v0 = vpop.f32.mrb[46].mxu0  ;;  %1187 = sbr.rel (%p1412_p6) target bundleno = 744 (0x2e8), region = 52 }
 0x2da   : > { %v1500_v35 = vpop.f32.mrb[47].mxu0  ;;  %v1200_v28 = vld [vmem:[#allocation2 + $0x60] sm:$0xff] (!%p1412_p6) }
 0x2db   : > { %1182 = vst [vmem:[#allocation2 + $0x70] sm:$0xff] %v1166_v9  ;;  %v1501_v16 = vadd.f32 %v1500_v35, %v1499_v0  ;;  %1216 = vst [vmem:[%s2399_s21 + $0x60] sm:$0xff] (!%p1412_p6), %v1200_v28 }
 0x2dd   : > { %v1167_v4 = vadd.f32 %v1501_v16, %v974_v2 }
 0x2de   : > { %v1201_v44 = vld [vmem:[#allocation2 + $0x68] sm:$0xff] (!%p1412_p6) }
 0x2df   : > { %1183 = vst [vmem:[#allocation2 + $0x78] sm:$0xff] %v1167_v4  ;;  %1217 = vst [vmem:[%s2399_s21 + $0x68] sm:$0xff] (!%p1412_p6), %v1201_v44 }
 0x2e2   : > { %v1202_v55 = vld [vmem:[#allocation2 + $0x70] sm:$0xff] }
 0x2e3   : > { %1218 = vst [vmem:[%s2399_s21 + $0x70] sm:$0xff] %v1202_v55 }
 0x2e6   : > { %v1203_v33 = vld [vmem:[#allocation2 + $0x78] sm:$0xff] }
 0x2e7   : > { %1219 = vst [vmem:[%s2399_s21 + $0x78] sm:$0xff] %v1203_v33 }
 0x2e8 PF: > { %s1421_s18 = sshll.u32 %s2066_s19, 11  ;;  %s2885_s11 = sld [smem:[#allocation20_spill]] }
 0x2e9   : > { %s1234_s4 = sshll.u32 %s2399_s21, 4  ;;  %s1221_s6 = scalar_lea.sflag [#allocation5], %s2379_s9  ;;  %s2779_s4 = int_to_ptr.vmem [resolvable:$true] %s1234_s4 }
 0x2ea   : > { %s1952_s26 = scalar_lea.vmem %s2779_s4, 2048  ;;  %p2886_p3 = scmp.ne.s32.totalorder %s2876_s25, 0 }
 0x2eb   : > { %p1953_p4 = scmp.ne.s32.totalorder %s2779_s4, %s1952_s26  ;;  %s2089_s3 = smov [#allocation9]  }
 0x2ec   : > { %s1956_s5 = sshll.u32 %s2089_s3, 4  ;;  %s1957_s5 = int_to_ptr.vmem [resolvable:$false] %s1956_s5 }
 0x2ed   : > { %p1954_p2 = pnand %p1953_p4, %p2886_p3  ;;  %s1958_s19 = scalar_lea.vmem %s1957_s5, 4096 }
 0x2ee   : > { %s2776_s24 = scalar_lea.hbm %s2885_s11, %s1421_s18  ;;  %p1959_p7 = scmp.lt.s32.totalorder %s2779_s4, %s1957_s5 }
 0x2ef   : > { %p1955_p11 = pneg %p1954_p2  ;;  %p1960_p5 = scmp.lt.s32.totalorder %s1958_s19, %s1952_s26 }
 0x2f1   : > { %p1961_p0 = por %p1960_p5, %p1959_p7 }
 0x2f3   : > { %p1962_p13 = pnand %p1961_p0, %p1955_p11 }
 0x2f5   : > { %1965 = shalt.err (!%p1962_p13)
}
 0x2f6   : > { %s1966_s14 = scalar_lea.hbm %s2776_s24, 2048  ;;  %s1970_s10 = scalar_lea.hbm %s2885_s11, 4096 }
 0x2f7   : > { %p1967_p10 = scmp.ne.s32.totalorder %s2776_s24, %s1966_s14  ;;  %p1971_p9 = scmp.lt.u32.totalorder %s2776_s24, %s2885_s11 }
 0x2f8   : > { %p1972_p8 = scmp.lt.u32.totalorder %s1970_s10, %s1966_s14  ;;  %p1974_p4 = scmp.lt.u32.totalorder %s1966_s14, %s2776_s24 }
 0x2f9   : > { %p1968_p12 = pnand %p1967_p10, %p2886_p3 }
 0x2fa   : > { %p1973_p6 = por %p1972_p8, %p1971_p9 }
 0x2fb   : > { %p1969_p1 = pneg %p1968_p12 }
 0x2fc   : > { %p1975_p2 = por %p1974_p4, %p1973_p6 }
 0x2fe   : > { %p1976_p11 = pnand %p1975_p2, %p1969_p1 }
 0x300   : > { %1979 = shalt.err (!%p1976_p11)
}
 0x301   : > { %s2090_s8 = smov 128   ;;  %s2091_s29 = smov 8  }
 0x302   : > { %1620 = dma.vmem_to_hbm [thread:$0]  (%p2886_p3), %s2779_s4, 2048, %s2776_s24, %s1221_s6, %s2090_s8, %s2090_s8, %s2091_s29  }
 0x303 PF: > { %s2887_s21 = sld [smem:[#allocation14_spill]]  ;;  %p1637_p7 = scmp.ge.s32.totalorder %s2078_s22, 2 }
 0x304   : > { %p2888_p5 = scmp.ne.s32.totalorder %s2877_s7, 0 }
 0x306   : > { %p1633_p0 = pnand %p1637_p7, %p2888_p5 }
 0x309   : > { %s1249_s18 = sand.u32 1, %s2887_s21  }
 0x30a   : > { %s1250_s23 = scalar_lea.sflag [#allocation5], %s1249_s18 }
 0x30b   : > { %2033 = dma.done.wait (!%p1633_p0), %s1250_s23, 2048  }
 0x30c   : > { %2035 = vsyncadd (!%p1633_p0), %s1250_s23, 4294965248  ;;  %s22_s22 = sadd.s32 1, %s2078_s22   ;;  %s2889_s28 = sld [smem:[#allocation13_spill]] }
 0x30d   : > { %p19_p13 = scmp.ge.s32.totalorder %s22_s22, 6   ;;  %s2890_s14 = sld [smem:[#allocation17_spill]] }
 0x30e   : > { %s2891_s19 = sld [smem:[#allocation15_spill]]  ;;  %s2892_s25 = sld [smem:[#allocation16_spill]] }
 0x30f   : > { %s2893_s21 = sld [smem:[#allocation18_spill]]  ;;  %s2894_s12 = smov %s2042_s13 }
 0x310   : > { %s2896_s15 = smov %s2054_s16  ;;  %s2897_s16 = smov %s2058_s17 }
 0x311   : > { %s2898_s17 = smov %s2289_s1  ;;  %s2899_s18 = smov %s2070_s20 }
 0x312   : > { %s2895_s13 = smov %s2889_s28  ;;  %21 = sbr.rel (!%p19_p13) target bundleno = 14 (0xe), region = 109 }
 0x314   : > { %s2900_s20 = smov %s2892_s25 }
 0x319   :  { %1255 = vsyncpa [#allocation4], 1 }
 0x31a   :  { %1257 = vsyncpa [#allocation4 + $0x1], 1 }
 0x31b   :  { %1258 = vsyncpa [#allocation7], 1 }
 0x31c   :  { %1260 = vsyncpa [#allocation7 + $0x1], 1 }
 0x31d   :  { %1261 = vsyncpa [#allocation5], 1 }
 0x31e   :  { %1263 = vsyncpa [#allocation5 + $0x1], 1 }

</bundles_post_ra>
